<compile_context>
chip_gen: v6e
topology: v6e:2x2x1
jax: 0.10.0
libtpu: 0.0.40
codegen_flags: <defaults>
</compile_context>

<pallas_src>
import jax
import jax.numpy as jnp
from jax import lax
from jax.experimental import pallas as pl
from jax.experimental.pallas import tpu as pltpu

N_NODES = 16      # n_gene (DenseNet runs on the (N, N) reconstructed adjacency)
IN_FEATS = 8
HIDDEN = 32
OUT_FEATS = 16
BN_EPS = 1e-5
LN_EPS = 1e-5

# ---------------- packed parameter slab layout (P_ROWS x 128 lanes, f32) -----
RW0 = 0                      # layer0 [W_self | W_neigh]   (IN_FEATS, 2*HIDDEN)
RW1 = RW0 + IN_FEATS         # layer1                      (HIDDEN,   2*HIDDEN)
RW2 = RW1 + HIDDEN           # layer2                      (HIDDEN,   2*HIDDEN)
RWH = RW2 + HIDDEN           # fused mu/log_std head       (HIDDEN,   8*OUT_FEATS)
RB0 = RWH + HIDDEN           # bias rows (1 row each)
RB1 = RB0 + 1
RB2 = RB1 + 1
RBH = RB2 + 1
RDW = 112                    # DenseNet weights, 4 x (N, N)  (8-row aligned)
RLG = RDW + 4 * N_NODES      # LayerNorm gamma  (4 rows)
RLB = RLG + 4                # LayerNorm beta   (4 rows)
RDB = RLB + 4                # Linear bias      (4 rows)
P_ROWS = 192
P_LANES = 128

_HP = lax.Precision.HIGHEST  # full-f32 MXU passes (keeps kernel == reference)


def infer_net_kernel(a_ref, x_ref, noise2_ref, p_ref, out_ref):
    a = a_ref[...]                                   # (N, N) row-normalized adjacency

    def fused_sage(h, wrow, in_feats, brow, width):
        # rows wrow..wrow+in_feats of the slab hold [W_self | W_neigh] -> one
        # wide matmul replaces the two per-branch SAGEConv matmuls.
        w = p_ref[wrow:wrow + in_feats, 0:2 * width]
        b = p_ref[brow:brow + 1, 0:width]
        hw = jnp.dot(h, w, precision=_HP, preferred_element_type=jnp.float32)
        return (hw[:, :width]
                + jnp.dot(a, hw[:, width:], precision=_HP,
                          preferred_element_type=jnp.float32)
                + b)

    relu = lambda v: jnp.maximum(v, 0.0)

    # ----- encoder: 3 x SAGEConv('mean') + ReLU (BatchNorms folded into head) -----
    h = relu(fused_sage(x_ref[...], RW0, IN_FEATS, RB0, HIDDEN))
    h = relu(fused_sage(h, RW1, HIDDEN, RB1, HIDDEN))
    h = relu(fused_sage(h, RW2, HIDDEN, RB2, HIDDEN))

    # ----- fused head -> columns [mu | mu@R | log_std | log_std@R] (BN1/BN2/R folded) --
    head = fused_sage(h, RWH, HIDDEN, RBH, 4 * OUT_FEATS)        # (N, 4*OUT)
    zz = head[:, :2 * OUT_FEATS] + noise2_ref[...] * jnp.exp(head[:, 2 * OUT_FEATS:])
    z, zperm = zz[:, :OUT_FEATS], zz[:, OUT_FEATS:]              # z and z @ R

    # ----- decoder: _self_conv(z, z) == (z @ R) @ z.T  (FFT factors cancel exactly) ---
    out = lax.dot_general(zperm, z, (((1,), (1,)), ((), ())),
                          precision=_HP, preferred_element_type=jnp.float32)

    # ----- DenseNet: 4 x [LayerNorm -> Dropout(eval: identity) -> Linear -> ELU] ------
    # TODO(synk): Dropout(p=0.2) implemented as eval-mode identity (stochastic in train).
    for i in range(4):
        dw = p_ref[RDW + N_NODES * i: RDW + N_NODES * (i + 1), 0:N_NODES]
        g = p_ref[RLG + i: RLG + i + 1, 0:N_NODES]
        bt = p_ref[RLB + i: RLB + i + 1, 0:N_NODES]
        db = p_ref[RDB + i: RDB + i + 1, 0:N_NODES]
        mu = jnp.mean(out, axis=-1, keepdims=True)
        m2 = jnp.mean(out * out, axis=-1, keepdims=True)          # one-pass variance
        xn = (out - mu) * lax.rsqrt(m2 - mu * mu + LN_EPS) * g + bt
        lin = jnp.dot(xn, dw, precision=_HP, preferred_element_type=jnp.float32) + db
        # ELU(alpha=1); min() keeps the unselected exp branch finite.
        # TODO(synk): expm1 lowering is not guaranteed in Mosaic, so exp(x)-1 is used.
        out = jnp.where(lin > 0.0, lin, jnp.exp(jnp.minimum(lin, 0.0)) - 1.0)

    out_ref[...] = out


def pack_params(p):
    """One-time host-side fold/fuse/pack of all module parameters into one slab."""
    f32 = jnp.float32
    inv = jnp.asarray(1.0, f32) / jnp.sqrt(jnp.asarray(1.0 + BN_EPS, f32))
    s1 = (p["bn1_g"] * inv).reshape(-1)            # (HIDDEN,)  BN1 scale
    beta1 = p["bn1_b"].reshape(1, -1)              # (1, HIDDEN) BN1 shift
    s2 = (p["bn2_g"] * inv).reshape(1, -1)         # (1, OUT)   BN2 scale
    beta2 = p["bn2_b"].reshape(1, -1)              # (1, OUT)   BN2 shift

    # fused encoder weights: [W_self | W_neigh]
    w0 = jnp.concatenate([p["ws0"], p["wn0"]], axis=1)           # (IN, 2H)
    w1 = jnp.concatenate([p["ws1"], p["wn1"]], axis=1)           # (H, 2H)
    w2 = jnp.concatenate([p["ws2"], p["wn2"]], axis=1)           # (H, 2H)

    # BN1 fold: input scale -> weight rows; bias shift -> head bias.  Exact
    # because A is row-normalized ('mean' aggregator), so A @ const == const.
    wsm = p["wsm"] * s1[:, None] * s2              # BN2 scale folded on output cols
    wnm = p["wnm"] * s1[:, None] * s2
    wsl = p["wsl"] * s1[:, None]
    wnl = p["wnl"] * s1[:, None]
    bm = (p["bm"] + beta1 @ (p["wsm"] + p["wnm"])) * s2 + beta2
    bl = p["bl"] + beta1 @ (p["wsl"] + p["wnl"])

    # fold the FFT index-reversal permutation R (z @ R == z[:, ridx]) into a
    # second copy of the head: columns become [mu | mu@R | log_std | log_std@R].
    ridx = (-jnp.arange(OUT_FEATS)) % OUT_FEATS
    ws_head = jnp.concatenate([wsm, wsm[:, ridx], wsl, wsl[:, ridx]], axis=1)  # (H, 4*OUT)
    wn_head = jnp.concatenate([wnm, wnm[:, ridx], wnl, wnl[:, ridx]], axis=1)  # (H, 4*OUT)
    w_head = jnp.concatenate([ws_head, wn_head], axis=1)                       # (H, 8*OUT)
    b_head = jnp.concatenate([bm, bm[:, ridx], bl, bl[:, ridx]], axis=1)       # (1, 4*OUT)

    slab = jnp.zeros((P_ROWS, P_LANES), f32)
    slab = slab.at[RW0:RW0 + IN_FEATS, :2 * HIDDEN].set(w0)
    slab = slab.at[RW1:RW1 + HIDDEN, :2 * HIDDEN].set(w1)
    slab = slab.at[RW2:RW2 + HIDDEN, :2 * HIDDEN].set(w2)
    slab = slab.at[RWH:RWH + HIDDEN, :8 * OUT_FEATS].set(w_head)
    slab = slab.at[RB0, :HIDDEN].set(p["b0"].reshape(-1))
    slab = slab.at[RB1, :HIDDEN].set(p["b1"].reshape(-1))
    slab = slab.at[RB2, :HIDDEN].set(p["b2"].reshape(-1))
    slab = slab.at[RBH, :4 * OUT_FEATS].set(b_head.reshape(-1))
    slab = slab.at[RDW:RDW + 4 * N_NODES, :N_NODES].set(
        p["dw"].reshape(4 * N_NODES, N_NODES))
    slab = slab.at[RLG:RLG + 4, :N_NODES].set(p["ln_g"].reshape(4, N_NODES))
    slab = slab.at[RLB:RLB + 4, :N_NODES].set(p["ln_b"].reshape(4, N_NODES))
    slab = slab.at[RDB:RDB + 4, :N_NODES].set(p["db"].reshape(4, N_NODES))
    return {"slab": slab, "noise_scale": s2}


def infer_net_forward(packed, a_mean, x, noise):
    # per-call prep: BN2 scale on noise and the R-permuted copy (tiny, wrapper-side).
    ridx = (-jnp.arange(OUT_FEATS)) % OUT_FEATS
    noise_f = noise * packed["noise_scale"]
    noise2 = jnp.concatenate([noise_f, noise_f[:, ridx]], axis=1)   # (N, 2*OUT)

    vmem = lambda: pl.BlockSpec(memory_space=pltpu.MemorySpace.VMEM)
    return pl.pallas_call(
        infer_net_kernel,
        out_shape=jax.ShapeDtypeStruct((N_NODES, N_NODES), jnp.float32),
        in_specs=[vmem(), vmem(), vmem(), vmem()],
        out_specs=vmem(),
    )(a_mean, x, noise2, packed["slab"])


def make_params(key):
    ks = jax.random.split(key, 32)
    f32 = jnp.float32

    def w(k, shape, fan_in):
        return jax.random.normal(k, shape, f32) / jnp.sqrt(f32(fan_in))

    p = {}
    # base encoder SAGE layers
    p["ws0"] = w(ks[0], (IN_FEATS, HIDDEN), IN_FEATS)
    p["wn0"] = w(ks[1], (IN_FEATS, HIDDEN), IN_FEATS)
    p["b0"] = jnp.zeros((1, HIDDEN), f32)
    p["ws1"] = w(ks[2], (HIDDEN, HIDDEN), HIDDEN)
    p["wn1"] = w(ks[3], (HIDDEN, HIDDEN), HIDDEN)
    p["b1"] = jnp.zeros((1, HIDDEN), f32)
    p["ws2"] = w(ks[4], (HIDDEN, HIDDEN), HIDDEN)
    p["wn2"] = w(ks[5], (HIDDEN, HIDDEN), HIDDEN)
    p["b2"] = jnp.zeros((1, HIDDEN), f32)
    # batch norms (eval mode; weight=1, bias=0; running mean=0, var=1)
    p["bn1_g"] = jnp.ones((1, HIDDEN), f32)
    p["bn1_b"] = jnp.zeros((1, HIDDEN), f32)
    p["bn2_g"] = jnp.ones((1, OUT_FEATS), f32)
    p["bn2_b"] = jnp.zeros((1, OUT_FEATS), f32)
    # mu / log_std heads
    p["wsm"] = w(ks[6], (HIDDEN, OUT_FEATS), HIDDEN)
    p["wnm"] = w(ks[7], (HIDDEN, OUT_FEATS), HIDDEN)
    p["bm"] = jnp.zeros((1, OUT_FEATS), f32)
    p["wsl"] = 0.1 * w(ks[8], (HIDDEN, OUT_FEATS), HIDDEN)
    p["wnl"] = 0.1 * w(ks[9], (HIDDEN, OUT_FEATS), HIDDEN)
    p["bl"] = jnp.zeros((1, OUT_FEATS), f32)
    # DenseNet (4 layers, n_gene -> n_gene); weights stored pre-transposed (in, out)
    p["ln_g"] = jnp.ones((4, 1, N_NODES), f32)
    p["ln_b"] = jnp.zeros((4, 1, N_NODES), f32)
    dws, dbs = [], []
    for i in range(4):
        dws.append(w(ks[10 + i], (N_NODES, N_NODES), N_NODES))
        dbs.append(0.01 * jax.random.normal(ks[20 + i], (1, N_NODES), f32))
    p["dw"] = jnp.stack(dws)
    p["db"] = jnp.stack(dbs)
    return p


def reference_forward(params, a_mean, x, noise):
    """Pure-JAX mirror of the PyTorch forward (uses the actual FFT decoder path)."""
    mm = lambda u, v: jnp.matmul(u, v, precision=_HP)
    relu = lambda v: jnp.maximum(v, 0.0)
    sage = lambda h, ws, wn, b: mm(h, ws) + mm(mm(a_mean, h), wn) + b
    h = relu(sage(x, params["ws0"], params["wn0"], params["b0"]))
    h = relu(sage(h, params["ws1"], params["wn1"], params["b1"]))
    h = relu(sage(h, params["ws2"], params["wn2"], params["b2"]))
    h = h / jnp.sqrt(1.0 + BN_EPS) * params["bn1_g"] + params["bn1_b"]
    mean = sage(h, params["wsm"], params["wnm"], params["bm"])
    log_std = sage(h, params["wsl"], params["wnl"], params["bl"])
    z = mean + noise * jnp.exp(log_std)
    z = z / jnp.sqrt(1.0 + BN_EPS) * params["bn2_g"] + params["bn2_b"]
    # _self_conv with real FFTs (validates the algebraic shortcut used in-kernel)
    sig = jnp.fft.fft2(z, norm="ortho")
    adj = jnp.fft.ifft2(mm(sig, sig.T), norm="ortho")
    out = jnp.real(adj).astype(jnp.float32)
    for i in range(4):
        mu = jnp.mean(out, axis=-1, keepdims=True)
        var = jnp.mean((out - mu) ** 2, axis=-1, keepdims=True)
        xn = (out - mu) / jnp.sqrt(var + LN_EPS)
        xn = xn * params["ln_g"][i] + params["ln_b"][i]
        lin = mm(xn, params["dw"][i]) + params["db"][i]
        out = jnp.where(lin > 0.0, lin, jnp.expm1(jnp.minimum(lin, 0.0)))
    return out


if __name__ == "__main__":
    key = jax.random.PRNGKey(0)
    k_x, k_noise, k_param = jax.random.split(key, 3)

    # synthetic graph: ring with both neighbors -> degree 2, 'mean' aggregator
    adj = jnp.zeros((N_NODES, N_NODES), jnp.float32)
    i = jnp.arange(N_NODES)
    adj = adj.at[i, (i + 1) % N_NODES].set(1.0)
    adj = adj.at[i, (i - 1) % N_NODES].set(1.0)
    a_mean = adj / jnp.sum(adj, axis=1, keepdims=True)

    x = jax.random.normal(k_x, (N_NODES, IN_FEATS), jnp.float32)
    noise = jax.random.normal(k_noise, (N_NODES, OUT_FEATS), jnp.float32)
    params = make_params(k_param)
    packed = pack_params(params)   # one-time: fold BN1/BN2/R, fuse weights, pack slab

    out = infer_net_forward(packed, a_mean, x, noise)
    jax.block_until_ready(out)

    ref = reference_forward(params, a_mean, x, noise)
    assert out.shape == (N_NODES, N_NODES)
    # the FFT shortcut and the BN/R folds are exact; tolerance tightened accordingly
    assert jnp.allclose(out, ref, rtol=1e-4, atol=2e-5), "kernel/reference mismatch"

    print("KERNEL_OK")
</pallas_src>

<mosaic_0001>
module attributes {stable_mosaic.version = 11 : i64} {
  func.func @infer_net_kernel(%arg0: memref<16x16xf32, #tpu.memory_space<vmem>>, %arg1: memref<16x8xf32, #tpu.memory_space<vmem>>, %arg2: memref<16x32xf32, #tpu.memory_space<vmem>>, %arg3: memref<192x128xf32, #tpu.memory_space<vmem>>, %arg4: memref<16x16xf32, #tpu.memory_space<vmem>>) attributes {dimension_semantics = [], scalar_prefetch = 0 : i64, scratch_operands = 0 : i64, tpu.core_type = #tpu.core_type<tc>} {
    %c0 = arith.constant 0 : index
    %c0_0 = arith.constant 0 : index
    %0 = vector.load %arg0[%c0, %c0_0] : memref<16x16xf32, #tpu.memory_space<vmem>>, vector<16x16xf32>
    %c0_1 = arith.constant 0 : index
    %c0_2 = arith.constant 0 : index
    %1 = vector.load %arg1[%c0_1, %c0_2] : memref<16x8xf32, #tpu.memory_space<vmem>>, vector<16x8xf32>
    %c0_3 = arith.constant 0 : index
    %c0_4 = arith.constant 0 : index
    %2 = vector.load %arg3[%c0_3, %c0_4] : memref<192x128xf32, #tpu.memory_space<vmem>>, vector<8x64xf32>
    %c104 = arith.constant 104 : index
    %c0_5 = arith.constant 0 : index
    %3 = vector.load %arg3[%c104, %c0_5] : memref<192x128xf32, #tpu.memory_space<vmem>>, vector<1x32xf32>
    %cst = arith.constant dense<0.000000e+00> : vector<16x64xf32>
    %4 = tpu.matmul %1, %2, %cst {dimension_numbers = #tpu.dot_dimension_numbers<[1], [0], [0], [1], [0, 0, 1, 1], [], []>, precision = #tpu.contract_precision<fp32>} : vector<16x8xf32>, vector<8x64xf32>, vector<16x64xf32> -> vector<16x64xf32>
    %5 = vector.extract_strided_slice %4 {offsets = [0, 0], sizes = [16, 32], strides = [1, 1]} : vector<16x64xf32> to vector<16x32xf32>
    %6 = vector.extract_strided_slice %4 {offsets = [0, 32], sizes = [16, 32], strides = [1, 1]} : vector<16x64xf32> to vector<16x32xf32>
    %cst_6 = arith.constant dense<0.000000e+00> : vector<16x32xf32>
    %7 = tpu.matmul %0, %6, %cst_6 {dimension_numbers = #tpu.dot_dimension_numbers<[1], [0], [0], [1], [0, 0, 1, 1], [], []>, precision = #tpu.contract_precision<fp32>} : vector<16x16xf32>, vector<16x32xf32>, vector<16x32xf32> -> vector<16x32xf32>
    %8 = arith.addf %5, %7 : vector<16x32xf32>
    %9 = vector.broadcast %3 : vector<1x32xf32> to vector<16x32xf32>
    %10 = arith.addf %8, %9 : vector<16x32xf32>
    %cst_7 = arith.constant 0.000000e+00 : f32
    %11 = vector.broadcast %cst_7 : f32 to vector<16x32xf32>
    %12 = arith.maximumf %10, %11 : vector<16x32xf32>
    %c8 = arith.constant 8 : index
    %c0_8 = arith.constant 0 : index
    %13 = vector.load %arg3[%c8, %c0_8] : memref<192x128xf32, #tpu.memory_space<vmem>>, vector<32x64xf32>
    %c105 = arith.constant 105 : index
    %c0_9 = arith.constant 0 : index
    %14 = vector.load %arg3[%c105, %c0_9] : memref<192x128xf32, #tpu.memory_space<vmem>>, vector<1x32xf32>
    %cst_10 = arith.constant dense<0.000000e+00> : vector<16x64xf32>
    %15 = tpu.matmul %12, %13, %cst_10 {dimension_numbers = #tpu.dot_dimension_numbers<[1], [0], [0], [1], [0, 0, 1, 1], [], []>, precision = #tpu.contract_precision<fp32>} : vector<16x32xf32>, vector<32x64xf32>, vector<16x64xf32> -> vector<16x64xf32>
    %16 = vector.extract_strided_slice %15 {offsets = [0, 0], sizes = [16, 32], strides = [1, 1]} : vector<16x64xf32> to vector<16x32xf32>
    %17 = vector.extract_strided_slice %15 {offsets = [0, 32], sizes = [16, 32], strides = [1, 1]} : vector<16x64xf32> to vector<16x32xf32>
    %cst_11 = arith.constant dense<0.000000e+00> : vector<16x32xf32>
    %18 = tpu.matmul %0, %17, %cst_11 {dimension_numbers = #tpu.dot_dimension_numbers<[1], [0], [0], [1], [0, 0, 1, 1], [], []>, precision = #tpu.contract_precision<fp32>} : vector<16x16xf32>, vector<16x32xf32>, vector<16x32xf32> -> vector<16x32xf32>
    %19 = arith.addf %16, %18 : vector<16x32xf32>
    %20 = vector.broadcast %14 : vector<1x32xf32> to vector<16x32xf32>
    %21 = arith.addf %19, %20 : vector<16x32xf32>
    %cst_12 = arith.constant 0.000000e+00 : f32
    %22 = vector.broadcast %cst_12 : f32 to vector<16x32xf32>
    %23 = arith.maximumf %21, %22 : vector<16x32xf32>
    %c40 = arith.constant 40 : index
    %c0_13 = arith.constant 0 : index
    %24 = vector.load %arg3[%c40, %c0_13] : memref<192x128xf32, #tpu.memory_space<vmem>>, vector<32x64xf32>
    %c106 = arith.constant 106 : index
    %c0_14 = arith.constant 0 : index
    %25 = vector.load %arg3[%c106, %c0_14] : memref<192x128xf32, #tpu.memory_space<vmem>>, vector<1x32xf32>
    %cst_15 = arith.constant dense<0.000000e+00> : vector<16x64xf32>
    %26 = tpu.matmul %23, %24, %cst_15 {dimension_numbers = #tpu.dot_dimension_numbers<[1], [0], [0], [1], [0, 0, 1, 1], [], []>, precision = #tpu.contract_precision<fp32>} : vector<16x32xf32>, vector<32x64xf32>, vector<16x64xf32> -> vector<16x64xf32>
    %27 = vector.extract_strided_slice %26 {offsets = [0, 0], sizes = [16, 32], strides = [1, 1]} : vector<16x64xf32> to vector<16x32xf32>
    %28 = vector.extract_strided_slice %26 {offsets = [0, 32], sizes = [16, 32], strides = [1, 1]} : vector<16x64xf32> to vector<16x32xf32>
    %cst_16 = arith.constant dense<0.000000e+00> : vector<16x32xf32>
    %29 = tpu.matmul %0, %28, %cst_16 {dimension_numbers = #tpu.dot_dimension_numbers<[1], [0], [0], [1], [0, 0, 1, 1], [], []>, precision = #tpu.contract_precision<fp32>} : vector<16x16xf32>, vector<16x32xf32>, vector<16x32xf32> -> vector<16x32xf32>
    %30 = arith.addf %27, %29 : vector<16x32xf32>
    %31 = vector.broadcast %25 : vector<1x32xf32> to vector<16x32xf32>
    %32 = arith.addf %30, %31 : vector<16x32xf32>
    %cst_17 = arith.constant 0.000000e+00 : f32
    %33 = vector.broadcast %cst_17 : f32 to vector<16x32xf32>
    %34 = arith.maximumf %32, %33 : vector<16x32xf32>
    %c72 = arith.constant 72 : index
    %c0_18 = arith.constant 0 : index
    %35 = vector.load %arg3[%c72, %c0_18] : memref<192x128xf32, #tpu.memory_space<vmem>>, vector<32x128xf32>
    %c107 = arith.constant 107 : index
    %c0_19 = arith.constant 0 : index
    %36 = vector.load %arg3[%c107, %c0_19] : memref<192x128xf32, #tpu.memory_space<vmem>>, vector<1x64xf32>
    %cst_20 = arith.constant dense<0.000000e+00> : vector<16x128xf32>
    %37 = tpu.matmul %34, %35, %cst_20 {dimension_numbers = #tpu.dot_dimension_numbers<[1], [0], [0], [1], [0, 0, 1, 1], [], []>, precision = #tpu.contract_precision<fp32>} : vector<16x32xf32>, vector<32x128xf32>, vector<16x128xf32> -> vector<16x128xf32>
    %38 = vector.extract_strided_slice %37 {offsets = [0, 0], sizes = [16, 64], strides = [1, 1]} : vector<16x128xf32> to vector<16x64xf32>
    %39 = vector.extract_strided_slice %37 {offsets = [0, 64], sizes = [16, 64], strides = [1, 1]} : vector<16x128xf32> to vector<16x64xf32>
    %cst_21 = arith.constant dense<0.000000e+00> : vector<16x64xf32>
    %40 = tpu.matmul %0, %39, %cst_21 {dimension_numbers = #tpu.dot_dimension_numbers<[1], [0], [0], [1], [0, 0, 1, 1], [], []>, precision = #tpu.contract_precision<fp32>} : vector<16x16xf32>, vector<16x64xf32>, vector<16x64xf32> -> vector<16x64xf32>
    %41 = arith.addf %38, %40 : vector<16x64xf32>
    %42 = vector.broadcast %36 : vector<1x64xf32> to vector<16x64xf32>
    %43 = arith.addf %41, %42 : vector<16x64xf32>
    %44 = vector.extract_strided_slice %43 {offsets = [0, 0], sizes = [16, 32], strides = [1, 1]} : vector<16x64xf32> to vector<16x32xf32>
    %c0_22 = arith.constant 0 : index
    %c0_23 = arith.constant 0 : index
    %45 = vector.load %arg2[%c0_22, %c0_23] : memref<16x32xf32, #tpu.memory_space<vmem>>, vector<16x32xf32>
    %46 = vector.extract_strided_slice %43 {offsets = [0, 32], sizes = [16, 32], strides = [1, 1]} : vector<16x64xf32> to vector<16x32xf32>
    %47 = math.exp %46 : vector<16x32xf32>
    %48 = arith.mulf %45, %47 : vector<16x32xf32>
    %49 = arith.addf %44, %48 : vector<16x32xf32>
    %50 = vector.extract_strided_slice %49 {offsets = [0, 0], sizes = [16, 16], strides = [1, 1]} : vector<16x32xf32> to vector<16x16xf32>
    %51 = vector.extract_strided_slice %49 {offsets = [0, 16], sizes = [16, 16], strides = [1, 1]} : vector<16x32xf32> to vector<16x16xf32>
    %cst_24 = arith.constant dense<0.000000e+00> : vector<16x16xf32>
    %52 = tpu.matmul %51, %50, %cst_24 {dimension_numbers = #tpu.dot_dimension_numbers<[1], [1], [0], [0], [0, 0, 1, 0], [], []>, precision = #tpu.contract_precision<fp32>} : vector<16x16xf32>, vector<16x16xf32>, vector<16x16xf32> -> vector<16x16xf32>
    %c112 = arith.constant 112 : index
    %c0_25 = arith.constant 0 : index
    %53 = vector.load %arg3[%c112, %c0_25] : memref<192x128xf32, #tpu.memory_space<vmem>>, vector<16x16xf32>
    %c176 = arith.constant 176 : index
    %c0_26 = arith.constant 0 : index
    %54 = vector.load %arg3[%c176, %c0_26] : memref<192x128xf32, #tpu.memory_space<vmem>>, vector<1x16xf32>
    %c180 = arith.constant 180 : index
    %c0_27 = arith.constant 0 : index
    %55 = vector.load %arg3[%c180, %c0_27] : memref<192x128xf32, #tpu.memory_space<vmem>>, vector<1x16xf32>
    %c184 = arith.constant 184 : index
    %c0_28 = arith.constant 0 : index
    %56 = vector.load %arg3[%c184, %c0_28] : memref<192x128xf32, #tpu.memory_space<vmem>>, vector<1x16xf32>
    %cst_29 = arith.constant dense<0.000000e+00> : vector<16xf32>
    %57 = vector.multi_reduction <add>, %52, %cst_29 [1] : vector<16x16xf32> to vector<16xf32>
    %58 = vector.shape_cast %57 : vector<16xf32> to vector<16x1xf32>
    %cst_30 = arith.constant 1.600000e+01 : f32
    %59 = vector.broadcast %cst_30 : f32 to vector<16x1xf32>
    %60 = arith.divf %58, %59 : vector<16x1xf32>
    %61 = arith.mulf %52, %52 : vector<16x16xf32>
    %cst_31 = arith.constant dense<0.000000e+00> : vector<16xf32>
    %62 = vector.multi_reduction <add>, %61, %cst_31 [1] : vector<16x16xf32> to vector<16xf32>
    %63 = vector.shape_cast %62 : vector<16xf32> to vector<16x1xf32>
    %cst_32 = arith.constant 1.600000e+01 : f32
    %64 = vector.broadcast %cst_32 : f32 to vector<16x1xf32>
    %65 = arith.divf %63, %64 : vector<16x1xf32>
    %66 = vector.broadcast %60 : vector<16x1xf32> to vector<16x16xf32>
    %67 = arith.subf %52, %66 : vector<16x16xf32>
    %68 = arith.mulf %60, %60 : vector<16x1xf32>
    %69 = arith.subf %65, %68 : vector<16x1xf32>
    %cst_33 = arith.constant 9.99999974E-6 : f32
    %70 = vector.broadcast %cst_33 : f32 to vector<16x1xf32>
    %71 = arith.addf %69, %70 : vector<16x1xf32>
    %72 = math.rsqrt %71 : vector<16x1xf32>
    %73 = vector.broadcast %72 : vector<16x1xf32> to vector<16x16xf32>
    %74 = arith.mulf %67, %73 : vector<16x16xf32>
    %75 = vector.broadcast %54 : vector<1x16xf32> to vector<16x16xf32>
    %76 = arith.mulf %74, %75 : vector<16x16xf32>
    %77 = vector.broadcast %55 : vector<1x16xf32> to vector<16x16xf32>
    %78 = arith.addf %76, %77 : vector<16x16xf32>
    %cst_34 = arith.constant dense<0.000000e+00> : vector<16x16xf32>
    %79 = tpu.matmul %78, %53, %cst_34 {dimension_numbers = #tpu.dot_dimension_numbers<[1], [0], [0], [1], [0, 0, 1, 1], [], []>, precision = #tpu.contract_precision<fp32>} : vector<16x16xf32>, vector<16x16xf32>, vector<16x16xf32> -> vector<16x16xf32>
    %80 = vector.broadcast %56 : vector<1x16xf32> to vector<16x16xf32>
    %81 = arith.addf %79, %80 : vector<16x16xf32>
    %cst_35 = arith.constant 0.000000e+00 : f32
    %82 = vector.broadcast %cst_35 : f32 to vector<16x16xf32>
    %83 = arith.cmpf ogt, %81, %82 : vector<16x16xf32>
    %cst_36 = arith.constant 0.000000e+00 : f32
    %84 = vector.broadcast %cst_36 : f32 to vector<16x16xf32>
    %85 = arith.minimumf %81, %84 : vector<16x16xf32>
    %86 = math.exp %85 : vector<16x16xf32>
    %cst_37 = arith.constant 1.000000e+00 : f32
    %87 = vector.broadcast %cst_37 : f32 to vector<16x16xf32>
    %88 = arith.subf %86, %87 : vector<16x16xf32>
    %89 = arith.select %83, %81, %88 : vector<16x16xi1>, vector<16x16xf32>
    %c128 = arith.constant 128 : index
    %c0_38 = arith.constant 0 : index
    %90 = vector.load %arg3[%c128, %c0_38] : memref<192x128xf32, #tpu.memory_space<vmem>>, vector<16x16xf32>
    %c177 = arith.constant 177 : index
    %c0_39 = arith.constant 0 : index
    %91 = vector.load %arg3[%c177, %c0_39] : memref<192x128xf32, #tpu.memory_space<vmem>>, vector<1x16xf32>
    %c181 = arith.constant 181 : index
    %c0_40 = arith.constant 0 : index
    %92 = vector.load %arg3[%c181, %c0_40] : memref<192x128xf32, #tpu.memory_space<vmem>>, vector<1x16xf32>
    %c185 = arith.constant 185 : index
    %c0_41 = arith.constant 0 : index
    %93 = vector.load %arg3[%c185, %c0_41] : memref<192x128xf32, #tpu.memory_space<vmem>>, vector<1x16xf32>
    %cst_42 = arith.constant dense<0.000000e+00> : vector<16xf32>
    %94 = vector.multi_reduction <add>, %89, %cst_42 [1] : vector<16x16xf32> to vector<16xf32>
    %95 = vector.shape_cast %94 : vector<16xf32> to vector<16x1xf32>
    %cst_43 = arith.constant 1.600000e+01 : f32
    %96 = vector.broadcast %cst_43 : f32 to vector<16x1xf32>
    %97 = arith.divf %95, %96 : vector<16x1xf32>
    %98 = arith.mulf %89, %89 : vector<16x16xf32>
    %cst_44 = arith.constant dense<0.000000e+00> : vector<16xf32>
    %99 = vector.multi_reduction <add>, %98, %cst_44 [1] : vector<16x16xf32> to vector<16xf32>
    %100 = vector.shape_cast %99 : vector<16xf32> to vector<16x1xf32>
    %cst_45 = arith.constant 1.600000e+01 : f32
    %101 = vector.broadcast %cst_45 : f32 to vector<16x1xf32>
    %102 = arith.divf %100, %101 : vector<16x1xf32>
    %103 = vector.broadcast %97 : vector<16x1xf32> to vector<16x16xf32>
    %104 = arith.subf %89, %103 : vector<16x16xf32>
    %105 = arith.mulf %97, %97 : vector<16x1xf32>
    %106 = arith.subf %102, %105 : vector<16x1xf32>
    %cst_46 = arith.constant 9.99999974E-6 : f32
    %107 = vector.broadcast %cst_46 : f32 to vector<16x1xf32>
    %108 = arith.addf %106, %107 : vector<16x1xf32>
    %109 = math.rsqrt %108 : vector<16x1xf32>
    %110 = vector.broadcast %109 : vector<16x1xf32> to vector<16x16xf32>
    %111 = arith.mulf %104, %110 : vector<16x16xf32>
    %112 = vector.broadcast %91 : vector<1x16xf32> to vector<16x16xf32>
    %113 = arith.mulf %111, %112 : vector<16x16xf32>
    %114 = vector.broadcast %92 : vector<1x16xf32> to vector<16x16xf32>
    %115 = arith.addf %113, %114 : vector<16x16xf32>
    %cst_47 = arith.constant dense<0.000000e+00> : vector<16x16xf32>
    %116 = tpu.matmul %115, %90, %cst_47 {dimension_numbers = #tpu.dot_dimension_numbers<[1], [0], [0], [1], [0, 0, 1, 1], [], []>, precision = #tpu.contract_precision<fp32>} : vector<16x16xf32>, vector<16x16xf32>, vector<16x16xf32> -> vector<16x16xf32>
    %117 = vector.broadcast %93 : vector<1x16xf32> to vector<16x16xf32>
    %118 = arith.addf %116, %117 : vector<16x16xf32>
    %cst_48 = arith.constant 0.000000e+00 : f32
    %119 = vector.broadcast %cst_48 : f32 to vector<16x16xf32>
    %120 = arith.cmpf ogt, %118, %119 : vector<16x16xf32>
    %cst_49 = arith.constant 0.000000e+00 : f32
    %121 = vector.broadcast %cst_49 : f32 to vector<16x16xf32>
    %122 = arith.minimumf %118, %121 : vector<16x16xf32>
    %123 = math.exp %122 : vector<16x16xf32>
    %cst_50 = arith.constant 1.000000e+00 : f32
    %124 = vector.broadcast %cst_50 : f32 to vector<16x16xf32>
    %125 = arith.subf %123, %124 : vector<16x16xf32>
    %126 = arith.select %120, %118, %125 : vector<16x16xi1>, vector<16x16xf32>
    %c144 = arith.constant 144 : index
    %c0_51 = arith.constant 0 : index
    %127 = vector.load %arg3[%c144, %c0_51] : memref<192x128xf32, #tpu.memory_space<vmem>>, vector<16x16xf32>
    %c178 = arith.constant 178 : index
    %c0_52 = arith.constant 0 : index
    %128 = vector.load %arg3[%c178, %c0_52] : memref<192x128xf32, #tpu.memory_space<vmem>>, vector<1x16xf32>
    %c182 = arith.constant 182 : index
    %c0_53 = arith.constant 0 : index
    %129 = vector.load %arg3[%c182, %c0_53] : memref<192x128xf32, #tpu.memory_space<vmem>>, vector<1x16xf32>
    %c186 = arith.constant 186 : index
    %c0_54 = arith.constant 0 : index
    %130 = vector.load %arg3[%c186, %c0_54] : memref<192x128xf32, #tpu.memory_space<vmem>>, vector<1x16xf32>
    %cst_55 = arith.constant dense<0.000000e+00> : vector<16xf32>
    %131 = vector.multi_reduction <add>, %126, %cst_55 [1] : vector<16x16xf32> to vector<16xf32>
    %132 = vector.shape_cast %131 : vector<16xf32> to vector<16x1xf32>
    %cst_56 = arith.constant 1.600000e+01 : f32
    %133 = vector.broadcast %cst_56 : f32 to vector<16x1xf32>
    %134 = arith.divf %132, %133 : vector<16x1xf32>
    %135 = arith.mulf %126, %126 : vector<16x16xf32>
    %cst_57 = arith.constant dense<0.000000e+00> : vector<16xf32>
    %136 = vector.multi_reduction <add>, %135, %cst_57 [1] : vector<16x16xf32> to vector<16xf32>
    %137 = vector.shape_cast %136 : vector<16xf32> to vector<16x1xf32>
    %cst_58 = arith.constant 1.600000e+01 : f32
    %138 = vector.broadcast %cst_58 : f32 to vector<16x1xf32>
    %139 = arith.divf %137, %138 : vector<16x1xf32>
    %140 = vector.broadcast %134 : vector<16x1xf32> to vector<16x16xf32>
    %141 = arith.subf %126, %140 : vector<16x16xf32>
    %142 = arith.mulf %134, %134 : vector<16x1xf32>
    %143 = arith.subf %139, %142 : vector<16x1xf32>
    %cst_59 = arith.constant 9.99999974E-6 : f32
    %144 = vector.broadcast %cst_59 : f32 to vector<16x1xf32>
    %145 = arith.addf %143, %144 : vector<16x1xf32>
    %146 = math.rsqrt %145 : vector<16x1xf32>
    %147 = vector.broadcast %146 : vector<16x1xf32> to vector<16x16xf32>
    %148 = arith.mulf %141, %147 : vector<16x16xf32>
    %149 = vector.broadcast %128 : vector<1x16xf32> to vector<16x16xf32>
    %150 = arith.mulf %148, %149 : vector<16x16xf32>
    %151 = vector.broadcast %129 : vector<1x16xf32> to vector<16x16xf32>
    %152 = arith.addf %150, %151 : vector<16x16xf32>
    %cst_60 = arith.constant dense<0.000000e+00> : vector<16x16xf32>
    %153 = tpu.matmul %152, %127, %cst_60 {dimension_numbers = #tpu.dot_dimension_numbers<[1], [0], [0], [1], [0, 0, 1, 1], [], []>, precision = #tpu.contract_precision<fp32>} : vector<16x16xf32>, vector<16x16xf32>, vector<16x16xf32> -> vector<16x16xf32>
    %154 = vector.broadcast %130 : vector<1x16xf32> to vector<16x16xf32>
    %155 = arith.addf %153, %154 : vector<16x16xf32>
    %cst_61 = arith.constant 0.000000e+00 : f32
    %156 = vector.broadcast %cst_61 : f32 to vector<16x16xf32>
    %157 = arith.cmpf ogt, %155, %156 : vector<16x16xf32>
    %cst_62 = arith.constant 0.000000e+00 : f32
    %158 = vector.broadcast %cst_62 : f32 to vector<16x16xf32>
    %159 = arith.minimumf %155, %158 : vector<16x16xf32>
    %160 = math.exp %159 : vector<16x16xf32>
    %cst_63 = arith.constant 1.000000e+00 : f32
    %161 = vector.broadcast %cst_63 : f32 to vector<16x16xf32>
    %162 = arith.subf %160, %161 : vector<16x16xf32>
    %163 = arith.select %157, %155, %162 : vector<16x16xi1>, vector<16x16xf32>
    %c160 = arith.constant 160 : index
    %c0_64 = arith.constant 0 : index
    %164 = vector.load %arg3[%c160, %c0_64] : memref<192x128xf32, #tpu.memory_space<vmem>>, vector<16x16xf32>
    %c179 = arith.constant 179 : index
    %c0_65 = arith.constant 0 : index
    %165 = vector.load %arg3[%c179, %c0_65] : memref<192x128xf32, #tpu.memory_space<vmem>>, vector<1x16xf32>
    %c183 = arith.constant 183 : index
    %c0_66 = arith.constant 0 : index
    %166 = vector.load %arg3[%c183, %c0_66] : memref<192x128xf32, #tpu.memory_space<vmem>>, vector<1x16xf32>
    %c187 = arith.constant 187 : index
    %c0_67 = arith.constant 0 : index
    %167 = vector.load %arg3[%c187, %c0_67] : memref<192x128xf32, #tpu.memory_space<vmem>>, vector<1x16xf32>
    %cst_68 = arith.constant dense<0.000000e+00> : vector<16xf32>
    %168 = vector.multi_reduction <add>, %163, %cst_68 [1] : vector<16x16xf32> to vector<16xf32>
    %169 = vector.shape_cast %168 : vector<16xf32> to vector<16x1xf32>
    %cst_69 = arith.constant 1.600000e+01 : f32
    %170 = vector.broadcast %cst_69 : f32 to vector<16x1xf32>
    %171 = arith.divf %169, %170 : vector<16x1xf32>
    %172 = arith.mulf %163, %163 : vector<16x16xf32>
    %cst_70 = arith.constant dense<0.000000e+00> : vector<16xf32>
    %173 = vector.multi_reduction <add>, %172, %cst_70 [1] : vector<16x16xf32> to vector<16xf32>
    %174 = vector.shape_cast %173 : vector<16xf32> to vector<16x1xf32>
    %cst_71 = arith.constant 1.600000e+01 : f32
    %175 = vector.broadcast %cst_71 : f32 to vector<16x1xf32>
    %176 = arith.divf %174, %175 : vector<16x1xf32>
    %177 = vector.broadcast %171 : vector<16x1xf32> to vector<16x16xf32>
    %178 = arith.subf %163, %177 : vector<16x16xf32>
    %179 = arith.mulf %171, %171 : vector<16x1xf32>
    %180 = arith.subf %176, %179 : vector<16x1xf32>
    %cst_72 = arith.constant 9.99999974E-6 : f32
    %181 = vector.broadcast %cst_72 : f32 to vector<16x1xf32>
    %182 = arith.addf %180, %181 : vector<16x1xf32>
    %183 = math.rsqrt %182 : vector<16x1xf32>
    %184 = vector.broadcast %183 : vector<16x1xf32> to vector<16x16xf32>
    %185 = arith.mulf %178, %184 : vector<16x16xf32>
    %186 = vector.broadcast %165 : vector<1x16xf32> to vector<16x16xf32>
    %187 = arith.mulf %185, %186 : vector<16x16xf32>
    %188 = vector.broadcast %166 : vector<1x16xf32> to vector<16x16xf32>
    %189 = arith.addf %187, %188 : vector<16x16xf32>
    %cst_73 = arith.constant dense<0.000000e+00> : vector<16x16xf32>
    %190 = tpu.matmul %189, %164, %cst_73 {dimension_numbers = #tpu.dot_dimension_numbers<[1], [0], [0], [1], [0, 0, 1, 1], [], []>, precision = #tpu.contract_precision<fp32>} : vector<16x16xf32>, vector<16x16xf32>, vector<16x16xf32> -> vector<16x16xf32>
    %191 = vector.broadcast %167 : vector<1x16xf32> to vector<16x16xf32>
    %192 = arith.addf %190, %191 : vector<16x16xf32>
    %cst_74 = arith.constant 0.000000e+00 : f32
    %193 = vector.broadcast %cst_74 : f32 to vector<16x16xf32>
    %194 = arith.cmpf ogt, %192, %193 : vector<16x16xf32>
    %cst_75 = arith.constant 0.000000e+00 : f32
    %195 = vector.broadcast %cst_75 : f32 to vector<16x16xf32>
    %196 = arith.minimumf %192, %195 : vector<16x16xf32>
    %197 = math.exp %196 : vector<16x16xf32>
    %cst_76 = arith.constant 1.000000e+00 : f32
    %198 = vector.broadcast %cst_76 : f32 to vector<16x16xf32>
    %199 = arith.subf %197, %198 : vector<16x16xf32>
    %200 = arith.select %194, %192, %199 : vector<16x16xi1>, vector<16x16xf32>
    %c0_77 = arith.constant 0 : index
    %c0_78 = arith.constant 0 : index
    %201 = vector.load %arg4[%c0_77, %c0_78] : memref<16x16xf32, #tpu.memory_space<vmem>>, vector<16x16xf32>
    tpu.vector_store %arg4[%c0_77, %c0_78], %200 {strides = array<i32>} : memref<16x16xf32, #tpu.memory_space<vmem>>, vector<16x16xf32>,
    return
  }
}

</mosaic_0001>

<bundles_post_ra>
// kernel: tpu_custom_call.1
= control target key start
LH: loop header
LB: loop body
LE: loop exit
PB: predicated region body
PF: predicated region fallthrough
CT: control target
= control target key end

     0   :  { %9 = vsyncpa [#allocation3], 0  ;;  %s8776_s0 = inlined_call_operand.vmem [shape: f32[16,16], index: 0, kind: input, shape index: {}]   ;;  %s8777_s1 = inlined_call_operand.vmem [shape: f32[16,8], index: 1, kind: input, shape index: {}]   ;;  %s8778_s2 = inlined_call_operand.hbm [shape: f32[16,32], index: 2, kind: input, shape index: {}]   ;;  %s8779_s3 = inlined_call_operand.hbm [shape: f32[192,128], index: 3, kind: input, shape index: {}]   ;;  %s8780_s4 = inlined_call_operand.hbm [shape: f32[16,16], index: 4, kind: output, shape index: {}]  }
   0x1   :  { %10 = vsyncpa [#allocation6], 0 }
   0x2   :  { %11 = vsyncpa [#allocation4], 0  ;;  %s8172_s15 = smov [#allocation2]  }
   0x3   :  { %s21_s16 = sshll.u32 %s8172_s15, 4  ;;  %s22_s16 = int_to_ptr.vmem [resolvable:$true] %s21_s16 }
   0x4   :  { %s8114_s17 = scalar_lea.vmem %s22_s16, 256  ;;  %p8119_p1 = scmp.lt.s32.totalorder %s22_s16, %s22_s16 }
   0x5   :  { %p8115_p0 = scmp.ne.s32.totalorder %s22_s16, %s8114_s17  ;;  %p8120_p2 = scmp.lt.s32.totalorder %s8114_s17, %s8114_s17 }
   0x7   :  { %p8121_p3 = por %p8120_p2, %p8119_p1 }
   0x9   :  { %p8122_p4 = pnand %p8121_p3, %p8115_p0 }
   0xb   :  { %8125 = shalt.err (!%p8122_p4)
}
   0xc   :  { %s8173_s18 = smov 128   ;;  %s8174_s19 = smov 8  }
   0xd   :  { %27 = dma.hbm_to_vmem [thread:$0]  %s8778_s2, 256, %s22_s16, [#allocation3], %s8173_s18, %s8173_s18, %s8174_s19  }
   0xe   :  { %s8175_s22 = smov [#allocation5]  }
   0xf   :  { %s33_s23 = sshll.u32 %s8175_s22, 4  ;;  %s34_s23 = int_to_ptr.vmem [resolvable:$true] %s33_s23 }
  0x10   :  { %s8134_s24 = scalar_lea.vmem %s34_s23, 3072  ;;  %p8139_p6 = scmp.lt.s32.totalorder %s34_s23, %s34_s23 }
  0x11   :  { %p8135_p5 = scmp.ne.s32.totalorder %s34_s23, %s8134_s24  ;;  %p8140_p7 = scmp.lt.s32.totalorder %s8134_s24, %s8134_s24 }
  0x13   :  { %p8141_p8 = por %p8140_p7, %p8139_p6 }
  0x15   :  { %p8142_p9 = pnand %p8141_p8, %p8135_p5 }
  0x17   :  { %8145 = shalt.err (!%p8142_p9)
}
  0x18   :  { %39 = dma.hbm_to_vmem [thread:$0]  %s8779_s3, 3072, %s34_s23, [#allocation6], %s8173_s18, %s8173_s18, %s8174_s19  }
  0x19   :  { %8166 = dma.done.wait [#allocation3], 256  }
  0x1a   :  { %8167 = vsyncadd [#allocation3], 4294967040 }
  0x1b   :  { %8168 = dma.done.wait [#allocation6], 3072  }
  0x1c   :  { %8169 = vsyncadd [#allocation6], 4294964224  ;;  %vm52_vm0 = vcmask 64512   ;;  %v50_v0 = vld [vmem:[#allocation5] sm:$0xff]  ;;  %v48_v1 = vld [vmem:[%s8777_s1] sm:$0xff]  ;;  %vm556_vm1 = vcmask 130048  }
  0x1d   :  { %v49_v2 = vld [vmem:[%s8777_s1 + $0x8] sm:$0xff]  ;;  %v90_v3 = vand.u32 4294901760, %v50_v0  ;;  %v54_v4 = vsel %vm52_vm0, %v48_v1, 0  ;;  %v46_v20 = vld [vmem:[%s8776_s0] sm:$0xff]  ;;  %s8176_s30 = smov 96   ;;  %vm1080_vm2 = vcmask 261120  }
  0x1e   :  { %v57_v5 = vsel %vm52_vm0, %v49_v2, 0  ;;  %v125_v6 = vand.u32 4294901760, %v54_v4  ;;  %v558_v21 = vsel %vm556_vm1, %v46_v20, 0  ;;  %v47_v49 = vld [vmem:[%s8776_s0 + $0x8] sm:$0xff]  ;;  %s8177_s0 = smov 64   ;;  %s8178_s7 = smov 112  }
  0x1f   :  { %v135_v7 = vand.u32 4294901760, %v57_v5  ;;  %7456 = vmatprep.subr.mxu0 %v90_v3  ;;  %v177_v8 = vsub.f32 %v50_v0, %v90_v3  ;;  %v8227_v22 = vand.u32 4294901760, %v558_v21  ;;  %v561_v50 = vsel %vm556_vm1, %v47_v49, 0  ;;  %s8179_s8 = smov [#allocation7]  }
  0x20   :  { %7457 = vmatpush3.msra.mxu0 %v90_v3  ;;  %v126_v9 = vsub.f32 %v54_v4, %v125_v6  ;;  %7463 = vmatprep.mubr.f32.mxu1 %v125_v6  ;;  %v8253_v51 = vand.u32 4294901760, %v561_v50  ;;  %v1078_v4 = vld [vmem:[#allocation5 + $0x20] sm:$0xff]  ;;  %s7077_s9 = sshll.u32 %s8179_s8, 4  ;;  %s7078_s9 = int_to_ptr.vmem [resolvable:$true] %s7077_s9 }
  0x21   :  { %v136_v10 = vsub.f32 %v57_v5, %v135_v7  ;;  %v178_v11 = vand.u32 4294901760, %v177_v8  ;;  %7466 = vmatprep.subr.mxu0 %v177_v8  ;;  %v8230_v25 = vsub.f32 %v558_v21, %v8227_v22  ;;  %v8275_v5 = vand.u32 4294901760, %v1078_v4  ;;  %s8146_s10 = scalar_lea.vmem %s7078_s9, 256  ;;  %p8151_p11 = scmp.lt.s32.totalorder %s7078_s9, %s7078_s9 }
  0x22   :  { %v127_v12 = vand.u32 4294901760, %v126_v9  ;;  %v8256_v52 = vsub.f32 %v561_v50, %v8253_v51  ;;  %p8147_p10 = scmp.ne.s32.totalorder %s7078_s9, %s8146_s10  ;;  %p8152_p12 = scmp.lt.s32.totalorder %s8146_s10, %s8146_s10 }
  0x23   :  { %v137_v13 = vand.u32 4294901760, %v136_v10  ;;  %v179_v14 = vsub.f32 %v177_v8, %v178_v11  ;;  %v8234_v28 = vand.u32 4294901760, %v8230_v25 }
  0x24   :  { %v128_v15 = vsub.f32 %v126_v9, %v127_v12  ;;  %v8259_v53 = vand.u32 4294901760, %v8256_v52  ;;  %p8153_p13 = por %p8152_p12, %p8151_p11 }
  0x25   :  { %v138_v16 = vsub.f32 %v136_v10, %v137_v13  ;;  %v180_v17 = vand.u32 4294901760, %v179_v14  ;;  %v633_v32 = vsub.f32 %v8230_v25, %v8234_v28 }
  0x26   :  { %v129_v18 = vand.u32 4294901760, %v128_v15  ;;  %v643_v56 = vsub.f32 %v8256_v52, %v8259_v53  ;;  %p8154_p0 = pnand %p8153_p13, %p8147_p10 }
  0x27   :  { %v139_v19 = vand.u32 4294901760, %v138_v16  ;;  %7461 = vmatprep.subr.mxu1 %v180_v17  ;;  %v8238_v37 = vand.u32 4294901760, %v633_v32 }
  0x28   :  { %7458 = vmatprep.mubr.f32.mxu0 %v129_v18  ;;  %7462 = vmatpush3.msra.mxu1 %v180_v17  ;;  %v8263_v60 = vand.u32 4294901760, %v643_v56 }
  0x29   :  { %7459 = vmatmul.mubr.f32.vlgmr.msra.gmra.mxu0 %v139_v19  ;;  %7464 = vmatmul.mubr.f32.vlgmr.msra.gmra.mxu1 %v135_v7 }
  0x2a   :  { %7467 = vmatpush3.msra.mxu0 %v177_v8  ;;  %7471 = vmatprep.subr.mxu1 %v90_v3 }
  0x2b   :  { %7468 = vmatprep.mubr.f32.mxu0 %v126_v9  ;;  %7472 = vmatpush3.msra.mxu1 %v90_v3  ;;  %v1076_v9 = vld [vmem:[#allocation5 + $0x10] sm:$0xff] }
  0x2c   :  { %7473 = vmatprep.mubr.f32.mxu1 %v127_v12  ;;  %7476 = vmatprep.subr.mxu0 %v178_v11  ;;  %v8290_v12 = vand.u32 4294901760, %v1076_v9 }
  0x2d   :  { %7469 = vmatmul.mubr.f32.vlgmr.msra.gmra.mxu0 %v136_v10  ;;  %7474 = vmatmul.mubr.f32.vlgmr.msra.gmra.mxu1 %v137_v13  ;;  %v1075_v13 = vld [vmem:[#allocation5 + $0x8] sm:$0xff] }
  0x2e   :  { %7477 = vmatpush3.msra.mxu0 %v178_v11  ;;  %7481 = vmatprep.subr.mxu1 %v90_v3  ;;  %v8300_v16 = vsub.f32 %v1076_v9, %v8290_v12  ;;  %v8302_v17 = vand.u32 4294901760, %v1075_v13 }
  0x2f   :  { %7478 = vmatprep.mubr.f32.mxu0 %v125_v6  ;;  %7482 = vmatpush3.msra.mxu1 %v90_v3 }
  0x30   :  { %7483 = vmatprep.mubr.f32.mxu1 %v125_v6  ;;  %v1077_v6 = vld [vmem:[#allocation5 + $0x18] sm:$0xff]  ;;  %v8309_v20 = vand.u32 4294901760, %v8300_v16  ;;  %v8312_v21 = vsub.f32 %v1075_v13, %v8302_v17 }
  0x31   :  { %7479 = vmatmul.mubr.f32.vlgmr.msra.gmra.mxu0 %v135_v7  ;;  %7484 = vmatmul.mubr.f32.vlgmr.msra.gmra.mxu1 %v135_v7  ;;  %v8278_v7 = vsub.f32 %v1078_v4, %v8275_v5  ;;  %v8280_v8 = vand.u32 4294901760, %v1077_v6 }
  0x32   :  { %7497 = vmatprep.mubr.f32.mxu1 %v8227_v22  ;;  %7490 = vmatprep.mubr.f32.mxu0 %v8238_v37 }
  0x33   :  { %v8285_v10 = vand.u32 4294901760, %v8278_v7  ;;  %v8288_v11 = vsub.f32 %v1077_v6, %v8280_v8 }
  0x35   :  { %v1204_v14 = vsub.f32 %v8278_v7, %v8285_v10  ;;  %v8297_v15 = vand.u32 4294901760, %v8288_v11 }
  0x37   :  { %v1205_v18 = vand.u32 4294901760, %v1204_v14  ;;  %v1211_v19 = vsub.f32 %v8288_v11, %v8297_v15 }
  0xe9   :  { %v7460_v23 = vpop.f32.mrf.mxu0  ;;  %v7465_v24 = vpop.f32.mrf.mxu1 }
  0xea   :  { %v224_v29 = vadd.f32 %v7465_v24, %v7460_v23  ;;  %v1212_v23 = vand.u32 4294901760, %v1211_v19  ;;  %v1218_v24 = vsub.f32 %v8300_v16, %v8309_v20 }
  0xeb   :  { %v131_v26 = vpop.f32.mrf.mxu0  ;;  %v217_v27 = vpop.f32.mrf.mxu1 }
  0xec   :  { %v218_v33 = vadd.f32 %v217_v27, %v131_v26  ;;  %v8319_v26 = vand.u32 4294901760, %v8312_v21  ;;  %v1219_v27 = vand.u32 4294901760, %v1218_v24 }
  0xed   :  { %v7470_v30 = vpop.f32.mrf.mxu0  ;;  %v7475_v31 = vpop.f32.mrf.mxu1 }
  0xee   :  { %v305_v34 = vadd.f32 %v7470_v30, %v224_v29  ;;  %v1225_v29 = vsub.f32 %v8312_v21, %v8319_v26 }
  0xef   :  { %v297_v35 = vpop.f32.mrf.mxu0  ;;  %v378_v36 = vpop.f32.mrf.mxu1 }
  0xf0   :  { %v387_v38 = vadd.f32 %v7475_v31, %v305_v34  ;;  %v298_v39 = vadd.f32 %v297_v35, %v218_v33  ;;  %v1226_v30 = vand.u32 4294901760, %v1225_v29 }
  0xf1   :  { %v7480_v40 = vpop.f32.mrf.mxu0  ;;  %v7485_v43 = vpop.f32.mrf.mxu1 }
  0xf2   :  { %v379_v41 = vadd.f32 %v378_v36, %v298_v39  ;;  %v467_v42 = vadd.f32 %v7480_v40, %v387_v38 }
  0xf3   :  { %v460_v44 = vpop.f32.mrf.mxu0  ;;  %v538_v47 = vpop.f32.mrf.mxu1 }
  0xf4   :  { %v8241_v45 = vadd.f32 %v7485_v43, %v467_v42  ;;  %v461_v46 = vadd.f32 %v460_v44, %v379_v41 }
  0xf6   :  { %552 = vrot.lane.b32.xlu0 %v8241_v45, %s8176_s30  ;;  %v8245_v48 = vadd.f32 %v538_v47, %v461_v46 }
  0xfa   :  { %550 = vrot.lane.b32.xlu0 %v8245_v48, %s8176_s30 }
 0x168   :  { %v553_v54 = vpop.permute.xlu0 %552 }
 0x169   :  { %v592_v55 = vand.u32 4294901760, %v553_v54 }
 0x16b   :  { %v680_v57 = vsub.f32 %v553_v54, %v592_v55  ;;  %7486 = vmatprep.subr.mxu0 %v592_v55 }
 0x16c   :  { %7487 = vmatpush3.msra.mxu0 %v592_v55  ;;  %v551_v58 = vpop.permute.xlu0 %550 }
 0x16d   :  { %v595_v59 = vand.u32 4294901760, %v551_v58  ;;  %v681_v61 = vand.u32 4294901760, %v680_v57 }
 0x16f   :  { %v687_v62 = vsub.f32 %v551_v58, %v595_v59  ;;  %7488 = vmatprep.subr.mxu0 %v595_v59  ;;  %v682_v63 = vsub.f32 %v680_v57, %v681_v61 }
 0x170   :  { %7489 = vmatpush3.msra.mxu0 %v595_v59 }
 0x171   :  { %7500 = vmatprep.subr.mxu0 %v680_v57  ;;  %7491 = vmatmul.mubr.f32.vlgmr.msra.gmra.mxu0 %v8263_v60  ;;  %v683_v0 = vand.u32 4294901760, %v682_v63  ;;  %v688_v1 = vand.u32 4294901760, %v687_v62 }
 0x172   :  { %7501 = vmatpush3.msra.mxu0 %v680_v57  ;;  %7504 = vmatprep.mubr.f32.mxu0 %v8230_v25  ;;  %v7090_v57 = vld [vmem:[#allocation5 + $0x68] ss:$0 sm:$0xff] }
 0x173   :  { %7493 = vmatprep.subr.mxu1 %v683_v0  ;;  %7502 = vmatprep.subr.mxu0 %v687_v62  ;;  %v689_v2 = vsub.f32 %v687_v62, %v688_v1 }
 0x174   :  { %7494 = vmatpush3.msra.mxu1 %v683_v0  ;;  %7503 = vmatpush3.msra.mxu0 %v687_v62 }
 0x175   :  { %7514 = vmatprep.subr.mxu0 %v681_v61  ;;  %7505 = vmatmul.mubr.f32.vlgmr.msra.gmra.mxu0 %v8256_v52  ;;  %v690_v3 = vand.u32 4294901760, %v689_v2 }
 0x176   :  { %7515 = vmatpush3.msra.mxu0 %v681_v61  ;;  %7518 = vmatprep.mubr.f32.mxu0 %v8227_v22 }
 0x177   :  { %7495 = vmatprep.subr.mxu1 %v690_v3  ;;  %7516 = vmatprep.subr.mxu0 %v688_v1 }
 0x178   :  { %7496 = vmatpush3.msra.mxu1 %v690_v3  ;;  %7517 = vmatpush3.msra.mxu0 %v688_v1 }
 0x179   :  { %7498 = vmatmul.mubr.f32.vlgmr.msra.gmra.mxu1 %v8253_v51  ;;  %7507 = vmatprep.subr.mxu1 %v592_v55 }
 0x17a   :  { %7508 = vmatpush3.msra.mxu1 %v592_v55  ;;  %7511 = vmatprep.mubr.f32.mxu1 %v8234_v28 }
 0x17b   :  { %7509 = vmatprep.subr.mxu1 %v595_v59  ;;  %7519 = vmatmul.mubr.f32.vlgmr.msra.gmra.mxu0 %v8253_v51 }
 0x17c   :  { %7510 = vmatpush3.msra.mxu1 %v595_v59  ;;  %7528 = vmatprep.subr.mxu0 %v8275_v5 }
 0x17d   :  { %7512 = vmatmul.mubr.f32.vlgmr.msra.gmra.mxu1 %v8259_v53  ;;  %7521 = vmatprep.subr.mxu1 %v592_v55 }
 0x17e   :  { %7522 = vmatpush3.msra.mxu1 %v592_v55  ;;  %7525 = vmatprep.mubr.f32.mxu1 %v8227_v22 }
 0x17f   :  { %7523 = vmatprep.subr.mxu1 %v595_v59  ;;  %7529 = vmatpush3.msra.mxu0 %v8275_v5 }
 0x180   :  { %7524 = vmatpush3.msra.mxu1 %v595_v59  ;;  %7530 = vmatprep.subr.mxu0 %v8280_v8 }
 0x181   :  { %7526 = vmatmul.mubr.f32.vlgmr.msra.gmra.mxu1 %v8253_v51  ;;  %7531 = vmatpush3.msra.mxu0 %v8280_v8 }
 0x182   :  { %7532 = vmatprep.subr.mxu0 %v8290_v12  ;;  %7539 = vmatprep.subr.mxu1 %v1205_v18 }
 0x183   :  { %7533 = vmatpush3.msra.mxu0 %v8290_v12  ;;  %7540 = vmatpush3.msra.mxu1 %v1205_v18 }
 0x184   :  { %7534 = vmatprep.subr.mxu0 %v8302_v17  ;;  %7541 = vmatprep.subr.mxu1 %v1212_v23 }
 0x185   :  { %7535 = vmatpush3.msra.mxu0 %v8302_v17  ;;  %7542 = vmatpush3.msra.mxu1 %v1212_v23 }
 0x186   :  { %7550 = vmatprep.subr.mxu0 %v8278_v7  ;;  %7543 = vmatprep.subr.mxu1 %v1219_v27 }
 0x187   :  { %7544 = vmatpush3.msra.mxu1 %v1219_v27 }
 0x188   :  { %7545 = vmatprep.subr.mxu1 %v1226_v30 }
 0x189   :  { %7546 = vmatpush3.msra.mxu1 %v1226_v30 }
 0x18a   :  { %7561 = vmatprep.subr.mxu1 %v8275_v5 }
 0x231   :  { %v7492_v31 = vpop.f32.mrf.mxu0 }
 0x233   :  { %v636_v32 = vpop.f32.mrf.mxu0 }
 0x235   :  { %v7506_v33 = vpop.f32.mrf.mxu0 }
 0x237   :  { %v809_v35 = vpop.f32.mrf.mxu0 }
 0x239   :  { %v7499_v34 = vpop.f32.mrf.mxu1 }
 0x23a   :  { %v734_v36 = vadd.f32 %v7499_v34, %v7492_v31 }
 0x23b   :  { %v727_v38 = vpop.f32.mrf.mxu1  ;;  %v7520_v42 = vpop.f32.mrf.mxu0 }
 0x23c   :  { %v817_v39 = vadd.f32 %v7506_v33, %v734_v36  ;;  %v728_v40 = vadd.f32 %v727_v38, %v636_v32 }
 0x23d   :  { %v7513_v41 = vpop.f32.mrf.mxu1  ;;  %v976_v50 = vpop.f32.mrf.mxu0 }
 0x23e   :  { %v810_v43 = vadd.f32 %v809_v35, %v728_v40  ;;  %v900_v44 = vadd.f32 %v7513_v41, %v817_v39 }
 0x23f   :  { %v891_v46 = vpop.f32.mrf.mxu1 }
 0x240   :  { %v983_v47 = vadd.f32 %v7520_v42, %v900_v44  ;;  %v892_v49 = vadd.f32 %v891_v46, %v810_v43 }
 0x241   :  { %v7527_v54 = vpop.f32.mrf.mxu1 }
 0x242   :  { %v977_v55 = vadd.f32 %v976_v50, %v892_v49  ;;  %v1062_v56 = vadd.f32 %v7527_v54, %v983_v47 }
 0x243   :  { %v1055_v58 = vpop.f32.mrf.mxu1 }
 0x244   :  { %v1066_v59 = vadd.f32 %v1062_v56, %v8241_v45  ;;  %v1056_v61 = vadd.f32 %v1055_v58, %v977_v55  ;;  %v2138_v56 = vld [vmem:[#allocation5 + $0x40] sm:$0xff]  ;;  %v2137_v58 = vld [vmem:[#allocation5 + $0x38] sm:$0xff] }
 0x246   :  { %v1072_v62 = vadd.f32 %v7090_v57, %v1066_v59  ;;  %v1065_v63 = vadd.f32 %v1056_v61, %v8245_v48  ;;  %v8384_v61 = vand.u32 4294901760, %v2137_v58 }
 0x248   :  { %v1074_v0 = vmax.f32 %v1072_v62, 0.0  ;;  %v1071_v1 = vadd.f32 %v7090_v57, %v1065_v63  ;;  %v8379_v57 = vand.u32 4294901760, %v2138_v56  ;;  %v2136_v62 = vld [vmem:[#allocation5 + $0x30] sm:$0xff] }
 0x24a   :  { %v1085_v2 = vsel %vm1080_vm2, %v1074_v0, 0  ;;  %v1073_v3 = vmax.f32 %v1071_v1, 0.0  ;;  %v8382_v59 = vsub.f32 %v2138_v56, %v8379_v57  ;;  %v8392_v0 = vsub.f32 %v2137_v58, %v8384_v61 }
 0x24b   :  { %v1166_v4 = vand.u32 4294901760, %v1085_v2  ;;  %v8394_v1 = vand.u32 4294901760, %v2136_v62 }
 0x24c   :  { %v1082_v6 = vsel %vm1080_vm2, %v1073_v3, 0  ;;  %v8389_v63 = vand.u32 4294901760, %v8382_v59 }
 0x24d   :  { %v1156_v9 = vand.u32 4294901760, %v1082_v6  ;;  %v1167_v13 = vsub.f32 %v1085_v2, %v1166_v4  ;;  %v2135_v2 = vld [vmem:[#allocation5 + $0x28] sm:$0xff] }
 0x24e   :  { %v2263_v3 = vsub.f32 %v8382_v59, %v8389_v63 }
 0x24f   :  { %7547 = vmatprep.mubr.f32.mxu1 %v1156_v9  ;;  %v1157_v14 = vsub.f32 %v1082_v6, %v1156_v9  ;;  %v1168_v18 = vand.u32 4294901760, %v1167_v13  ;;  %v8404_v6 = vsub.f32 %v2136_v62, %v8394_v1 }
 0x250   :  { %7548 = vmatmul.mubr.f32.vlgmr.msra.gmra.mxu1 %v1166_v4 }
 0x251   :  { %7562 = vmatpush3.msra.mxu1 %v8275_v5  ;;  %v1158_v45 = vand.u32 4294901760, %v1157_v14  ;;  %v1169_v19 = vsub.f32 %v1167_v13, %v1168_v18 }
 0x252   :  { %7563 = vmatprep.subr.mxu1 %v8280_v8 }
 0x253   :  { %7564 = vmatpush3.msra.mxu1 %v8280_v8  ;;  %7569 = vmatprep.mubr.f32.mxu1 %v1158_v45  ;;  %v1159_v48 = vsub.f32 %v1157_v14, %v1158_v45  ;;  %v1170_v24 = vand.u32 4294901760, %v1169_v19 }
 0x254   :  { %7565 = vmatprep.subr.mxu1 %v8290_v12 }
 0x255   :  { %7566 = vmatpush3.msra.mxu1 %v8290_v12  ;;  %v1160_v23 = vand.u32 4294901760, %v1159_v48 }
 0x256   :  { %7567 = vmatprep.subr.mxu1 %v8302_v17 }
 0x257   :  { %7568 = vmatpush3.msra.mxu1 %v8302_v17  ;;  %7536 = vmatprep.mubr.f32.mxu0 %v1160_v23 }
 0x258   :  { %7570 = vmatmul.mubr.f32.vlgmr.msra.gmra.mxu1 %v1168_v18  ;;  %7583 = vmatprep.subr.mxu1 %v8275_v5  ;;  %v8413_v18 = vand.u32 4294901760, %v8404_v6 }
 0x259   :  { %7537 = vmatmul.mubr.f32.vlgmr.msra.gmra.mxu0 %v1170_v24  ;;  %7584 = vmatpush3.msra.mxu1 %v8275_v5 }
 0x25a   :  { %7551 = vmatpush3.msra.mxu0 %v8278_v7  ;;  %7591 = vmatprep.mubr.f32.mxu1 %v1156_v9  ;;  %v2277_v19 = vsub.f32 %v8404_v6, %v8413_v18 }
 0x25b   :  { %7552 = vmatprep.subr.mxu0 %v8288_v11  ;;  %7558 = vmatprep.mubr.f32.mxu0 %v1157_v14 }
 0x25c   :  { %7585 = vmatprep.subr.mxu1 %v8280_v8  ;;  %7553 = vmatpush3.msra.mxu0 %v8288_v11  ;;  %v2278_v24 = vand.u32 4294901760, %v2277_v19 }
 0x25d   :  { %7586 = vmatpush3.msra.mxu1 %v8280_v8  ;;  %7554 = vmatprep.subr.mxu0 %v8300_v16 }
 0x25e   :  { %7587 = vmatprep.subr.mxu1 %v8290_v12  ;;  %7555 = vmatpush3.msra.mxu0 %v8300_v16 }
 0x25f   :  { %7588 = vmatpush3.msra.mxu1 %v8290_v12  ;;  %7556 = vmatprep.subr.mxu0 %v8312_v21 }
 0x260   :  { %7589 = vmatprep.subr.mxu1 %v8302_v17  ;;  %7557 = vmatpush3.msra.mxu0 %v8312_v21 }
 0x261   :  { %7590 = vmatpush3.msra.mxu1 %v8302_v17  ;;  %7559 = vmatmul.mubr.f32.vlgmr.msra.gmra.mxu0 %v1167_v13  ;;  %v2264_v13 = vand.u32 4294901760, %v2263_v3 }
 0x262   :  { %7572 = vmatprep.subr.mxu0 %v8285_v10  ;;  %7592 = vmatmul.mubr.f32.vlgmr.msra.gmra.mxu1 %v1166_v4 }
 0x263   :  { %7573 = vmatpush3.msra.mxu0 %v8285_v10  ;;  %7580 = vmatprep.mubr.f32.mxu0 %v1156_v9  ;;  %v8406_v9 = vand.u32 4294901760, %v2135_v2 }
 0x264   :  { %7574 = vmatprep.subr.mxu0 %v8297_v15  ;;  %7605 = vmatprep.mubr.f32.mxu1 %v8227_v22 }
 0x265   :  { %7575 = vmatpush3.msra.mxu0 %v8297_v15  ;;  %v8416_v45 = vsub.f32 %v2135_v2, %v8406_v9 }
 0x266   :  { %7576 = vmatprep.subr.mxu0 %v8309_v20 }
 0x267   :  { %7577 = vmatpush3.msra.mxu0 %v8309_v20  ;;  %v8423_v23 = vand.u32 4294901760, %v8416_v45 }
 0x268   :  { %7578 = vmatprep.subr.mxu0 %v8319_v26 }
 0x269   :  { %7579 = vmatpush3.msra.mxu0 %v8319_v26 }
 0x26a   :  { %7581 = vmatmul.mubr.f32.vlgmr.msra.gmra.mxu0 %v1166_v4  ;;  %v8401_v4 = vand.u32 4294901760, %v8392_v0 }
 0x26b   :  { %7598 = vmatprep.mubr.f32.mxu0 %v8238_v37 }
 0x26c   :  { %v2270_v14 = vsub.f32 %v8392_v0, %v8401_v4 }
 0x26e   :  { %v2271_v48 = vand.u32 4294901760, %v2270_v14 }
 0x310   :  { %v7549_v8 = vpop.f32.mrf.mxu1 }
 0x312   :  { %v1263_v12 = vpop.f32.mrf.mxu1 }
 0x318   :  { %v7571_v21 = vpop.f32.mrf.mxu1 }
 0x319   :  { %v7538_v5 = vpop.f32.mrf.mxu0 }
 0x31a   :  { %v1270_v11 = vadd.f32 %v7549_v8, %v7538_v5  ;;  %v1433_v20 = vpop.f32.mrf.mxu1  ;;  %v2284_v5 = vsub.f32 %v8416_v45, %v8423_v23 }
 0x31b   :  { %v1162_v7 = vpop.f32.mrf.mxu0 }
 0x31c   :  { %v1264_v17 = vadd.f32 %v1263_v12, %v1162_v7  ;;  %v2285_v7 = vand.u32 4294901760, %v2284_v5 }
 0x321   :  { %v7560_v10 = vpop.f32.mrf.mxu0 }
 0x322   :  { %v1357_v15 = vadd.f32 %v7560_v10, %v1270_v11  ;;  %v7593_v26 = vpop.f32.mrf.mxu1 }
 0x323   :  { %v1349_v16 = vpop.f32.mrf.mxu0 }
 0x324   :  { %v1350_v27 = vadd.f32 %v1349_v16, %v1264_v17  ;;  %v1442_v29 = vadd.f32 %v7571_v21, %v1357_v15  ;;  %v1605_v36 = vpop.f32.mrf.mxu1 }
 0x326   :  { %v1434_v32 = vadd.f32 %v1433_v20, %v1350_v27 }
 0x32a   :  { %v7582_v30 = vpop.f32.mrf.mxu0 }
 0x32b   :  { %v1531_v31 = vadd.f32 %v7582_v30, %v1442_v29 }
 0x32c   :  { %v1524_v33 = vpop.f32.mrf.mxu0 }
 0x32d   :  { %v1525_v34 = vadd.f32 %v1524_v33, %v1434_v32  ;;  %v8361_v35 = vadd.f32 %v7593_v26, %v1531_v31 }
 0x32f   :  { %1619 = vrot.lane.b32.xlu1 %v8361_v35, %s8176_s30  ;;  %v8365_v38 = vadd.f32 %v1605_v36, %v1525_v34 }
 0x333   :  { %1617 = vrot.lane.b32.xlu1 %v8365_v38, %s8176_s30 }
 0x3a1   :  { %v1620_v39 = vpop.permute.xlu1 %1619 }
 0x3a2   :  { %v1652_v40 = vand.u32 4294901760, %v1620_v39 }
 0x3a4   :  { %v1740_v41 = vsub.f32 %v1620_v39, %v1652_v40  ;;  %7594 = vmatprep.subr.mxu0 %v1652_v40 }
 0x3a5   :  { %7595 = vmatpush3.msra.mxu0 %v1652_v40  ;;  %v1618_v42 = vpop.permute.xlu1 %1617 }
 0x3a6   :  { %v1655_v43 = vand.u32 4294901760, %v1618_v42  ;;  %v1741_v44 = vand.u32 4294901760, %v1740_v41 }
 0x3a8   :  { %v1747_v46 = vsub.f32 %v1618_v42, %v1655_v43  ;;  %7596 = vmatprep.subr.mxu0 %v1655_v43  ;;  %v1742_v47 = vsub.f32 %v1740_v41, %v1741_v44 }
 0x3a9   :  { %7597 = vmatpush3.msra.mxu0 %v1655_v43 }
 0x3aa   :  { %7608 = vmatprep.subr.mxu0 %v1740_v41  ;;  %7599 = vmatmul.mubr.f32.vlgmr.msra.gmra.mxu0 %v8263_v60  ;;  %v1743_v49 = vand.u32 4294901760, %v1742_v47  ;;  %v1748_v50 = vand.u32 4294901760, %v1747_v46 }
 0x3ab   :  { %7609 = vmatpush3.msra.mxu0 %v1740_v41  ;;  %7612 = vmatprep.mubr.f32.mxu0 %v8230_v25  ;;  %v7091_v41 = vld [vmem:[#allocation5 + $0x69] ss:$0 sm:$0xff] }
 0x3ac   :  { %7601 = vmatprep.subr.mxu1 %v1743_v49  ;;  %7610 = vmatprep.subr.mxu0 %v1747_v46  ;;  %v1749_v54 = vsub.f32 %v1747_v46, %v1748_v50 }
 0x3ad   :  { %7602 = vmatpush3.msra.mxu1 %v1743_v49  ;;  %7611 = vmatpush3.msra.mxu0 %v1747_v46 }
 0x3ae   :  { %7622 = vmatprep.subr.mxu0 %v1741_v44  ;;  %7613 = vmatmul.mubr.f32.vlgmr.msra.gmra.mxu0 %v8256_v52  ;;  %v1750_v55 = vand.u32 4294901760, %v1749_v54 }
 0x3af   :  { %7623 = vmatpush3.msra.mxu0 %v1741_v44  ;;  %7626 = vmatprep.mubr.f32.mxu0 %v8227_v22 }
 0x3b0   :  { %7603 = vmatprep.subr.mxu1 %v1750_v55  ;;  %7624 = vmatprep.subr.mxu0 %v1748_v50 }
 0x3b1   :  { %7604 = vmatpush3.msra.mxu1 %v1750_v55  ;;  %7625 = vmatpush3.msra.mxu0 %v1748_v50 }
 0x3b2   :  { %7606 = vmatmul.mubr.f32.vlgmr.msra.gmra.mxu1 %v8253_v51  ;;  %7615 = vmatprep.subr.mxu1 %v1652_v40 }
 0x3b3   :  { %7616 = vmatpush3.msra.mxu1 %v1652_v40  ;;  %7619 = vmatprep.mubr.f32.mxu1 %v8234_v28 }
 0x3b4   :  { %7617 = vmatprep.subr.mxu1 %v1655_v43  ;;  %7627 = vmatmul.mubr.f32.vlgmr.msra.gmra.mxu0 %v8253_v51 }
 0x3b5   :  { %7618 = vmatpush3.msra.mxu1 %v1655_v43  ;;  %7636 = vmatprep.subr.mxu0 %v8379_v57 }
 0x3b6   :  { %7620 = vmatmul.mubr.f32.vlgmr.msra.gmra.mxu1 %v8259_v53  ;;  %7629 = vmatprep.subr.mxu1 %v1652_v40 }
 0x3b7   :  { %7630 = vmatpush3.msra.mxu1 %v1652_v40  ;;  %7633 = vmatprep.mubr.f32.mxu1 %v8227_v22 }
 0x3b8   :  { %7631 = vmatprep.subr.mxu1 %v1655_v43  ;;  %7637 = vmatpush3.msra.mxu0 %v8379_v57 }
 0x3b9   :  { %7632 = vmatpush3.msra.mxu1 %v1655_v43  ;;  %7638 = vmatprep.subr.mxu0 %v8384_v61 }
 0x3ba   :  { %7634 = vmatmul.mubr.f32.vlgmr.msra.gmra.mxu1 %v8253_v51  ;;  %7639 = vmatpush3.msra.mxu0 %v8384_v61 }
 0x3bb   :  { %7640 = vmatprep.subr.mxu0 %v8394_v1  ;;  %7647 = vmatprep.subr.mxu1 %v2264_v13 }
 0x3bc   :  { %7641 = vmatpush3.msra.mxu0 %v8394_v1  ;;  %7648 = vmatpush3.msra.mxu1 %v2264_v13 }
 0x3bd   :  { %7642 = vmatprep.subr.mxu0 %v8406_v9  ;;  %7649 = vmatprep.subr.mxu1 %v2271_v48 }
 0x3be   :  { %7643 = vmatpush3.msra.mxu0 %v8406_v9  ;;  %7650 = vmatpush3.msra.mxu1 %v2271_v48 }
 0x3bf   :  { %7658 = vmatprep.subr.mxu0 %v8382_v59  ;;  %7651 = vmatprep.subr.mxu1 %v2278_v24 }
 0x3c0   :  { %7652 = vmatpush3.msra.mxu1 %v2278_v24 }
 0x3c1   :  { %7653 = vmatprep.subr.mxu1 %v2285_v7 }
 0x3c2   :  { %7654 = vmatpush3.msra.mxu1 %v2285_v7 }
 0x3c3   :  { %7669 = vmatprep.subr.mxu1 %v8379_v57 }
 0x46a   :  { %v7600_v8 = vpop.f32.mrf.mxu0 }
 0x46c   :  { %v1696_v10 = vpop.f32.mrf.mxu0 }
 0x46e   :  { %v7614_v11 = vpop.f32.mrf.mxu0 }
 0x470   :  { %v1869_v16 = vpop.f32.mrf.mxu0 }
 0x472   :  { %v7607_v12 = vpop.f32.mrf.mxu1 }
 0x473   :  { %v1794_v17 = vadd.f32 %v7607_v12, %v7600_v8 }
 0x474   :  { %v1787_v15 = vpop.f32.mrf.mxu1  ;;  %v7628_v20 = vpop.f32.mrf.mxu0 }
 0x475   :  { %v1877_v21 = vadd.f32 %v7614_v11, %v1794_v17  ;;  %v1788_v27 = vadd.f32 %v1787_v15, %v1696_v10 }
 0x476   :  { %v7621_v29 = vpop.f32.mrf.mxu1  ;;  %v2036_v34 = vpop.f32.mrf.mxu0 }
 0x477   :  { %v1870_v30 = vadd.f32 %v1869_v16, %v1788_v27  ;;  %v1960_v31 = vadd.f32 %v7621_v29, %v1877_v21 }
 0x478   :  { %v1951_v32 = vpop.f32.mrf.mxu1 }
 0x479   :  { %v2043_v26 = vadd.f32 %v7628_v20, %v1960_v31  ;;  %v1952_v33 = vadd.f32 %v1951_v32, %v1870_v30 }
 0x47a   :  { %v7635_v36 = vpop.f32.mrf.mxu1 }
 0x47b   :  { %v2037_v39 = vadd.f32 %v2036_v34, %v1952_v33  ;;  %v2122_v40 = vadd.f32 %v7635_v36, %v2043_v26 }
 0x47c   :  { %v2115_v42 = vpop.f32.mrf.mxu1 }
 0x47d   :  { %v2126_v43 = vadd.f32 %v2122_v40, %v8361_v35  ;;  %v2116_v44 = vadd.f32 %v2115_v42, %v2037_v39  ;;  %v3197_v40 = vld [vmem:[#allocation5 + $0x60] sm:$0xff]  ;;  %v3196_v42 = vld [vmem:[#allocation5 + $0x58] sm:$0xff] }
 0x47f   :  { %v2132_v46 = vadd.f32 %v7091_v41, %v2126_v43  ;;  %v2125_v47 = vadd.f32 %v2116_v44, %v8365_v38  ;;  %v8488_v44 = vand.u32 4294901760, %v3196_v42 }
 0x481   :  { %v2134_v49 = vmax.f32 %v2132_v46, 0.0  ;;  %v2131_v50 = vadd.f32 %v7091_v41, %v2125_v47  ;;  %v8483_v41 = vand.u32 4294901760, %v3197_v40  ;;  %v3195_v46 = vld [vmem:[#allocation5 + $0x50] sm:$0xff] }
 0x483   :  { %v2144_v54 = vsel %vm1080_vm2, %v2134_v49, 0  ;;  %v2133_v55 = vmax.f32 %v2131_v50, 0.0  ;;  %v8486_v43 = vsub.f32 %v3197_v40, %v8483_v41  ;;  %v8496_v49 = vsub.f32 %v3196_v42, %v8488_v44 }
 0x484   :  { %v2225_v56 = vand.u32 4294901760, %v2144_v54  ;;  %v8498_v50 = vand.u32 4294901760, %v3195_v46 }
 0x485   :  { %v2141_v58 = vsel %vm1080_vm2, %v2133_v55, 0  ;;  %v8493_v47 = vand.u32 4294901760, %v8486_v43 }
 0x486   :  { %v2215_v62 = vand.u32 4294901760, %v2141_v58  ;;  %v2226_v2 = vsub.f32 %v2144_v54, %v2225_v56  ;;  %v3194_v54 = vld [vmem:[#allocation5 + $0x48] sm:$0xff] }
 0x487   :  { %v3322_v55 = vsub.f32 %v8486_v43, %v8493_v47 }
 0x488   :  { %7655 = vmatprep.mubr.f32.mxu1 %v2215_v62  ;;  %v2216_v3 = vsub.f32 %v2141_v58, %v2215_v62  ;;  %v2227_v13 = vand.u32 4294901760, %v2226_v2  ;;  %v8508_v58 = vsub.f32 %v3195_v46, %v8498_v50 }
 0x489   :  { %7656 = vmatmul.mubr.f32.vlgmr.msra.gmra.mxu1 %v2225_v56 }
 0x48a   :  { %7670 = vmatpush3.msra.mxu1 %v8379_v57  ;;  %v2217_v35 = vand.u32 4294901760, %v2216_v3  ;;  %v2228_v14 = vsub.f32 %v2226_v2, %v2227_v13 }
 0x48b   :  { %7671 = vmatprep.subr.mxu1 %v8384_v61 }
 0x48c   :  { %7672 = vmatpush3.msra.mxu1 %v8384_v61  ;;  %7677 = vmatprep.mubr.f32.mxu1 %v2217_v35  ;;  %v2218_v38 = vsub.f32 %v2216_v3, %v2217_v35  ;;  %v2229_v19 = vand.u32 4294901760, %v2228_v14 }
 0x48d   :  { %7673 = vmatprep.subr.mxu1 %v8394_v1 }
 0x48e   :  { %7674 = vmatpush3.msra.mxu1 %v8394_v1  ;;  %v2219_v48 = vand.u32 4294901760, %v2218_v38 }
 0x48f   :  { %7675 = vmatprep.subr.mxu1 %v8406_v9 }
 0x490   :  { %7676 = vmatpush3.msra.mxu1 %v8406_v9  ;;  %7644 = vmatprep.mubr.f32.mxu0 %v2219_v48 }
 0x491   :  { %7678 = vmatmul.mubr.f32.vlgmr.msra.gmra.mxu1 %v2227_v13  ;;  %7691 = vmatprep.subr.mxu1 %v8379_v57  ;;  %v8517_v13 = vand.u32 4294901760, %v8508_v58 }
 0x492   :  { %7645 = vmatmul.mubr.f32.vlgmr.msra.gmra.mxu0 %v2229_v19  ;;  %7692 = vmatpush3.msra.mxu1 %v8379_v57 }
 0x493   :  { %7659 = vmatpush3.msra.mxu0 %v8382_v59  ;;  %7699 = vmatprep.mubr.f32.mxu1 %v2215_v62  ;;  %v3336_v14 = vsub.f32 %v8508_v58, %v8517_v13 }
 0x494   :  { %7660 = vmatprep.subr.mxu0 %v8392_v0  ;;  %7666 = vmatprep.mubr.f32.mxu0 %v2216_v3 }
 0x495   :  { %7693 = vmatprep.subr.mxu1 %v8384_v61  ;;  %7661 = vmatpush3.msra.mxu0 %v8392_v0  ;;  %v3337_v19 = vand.u32 4294901760, %v3336_v14 }
 0x496   :  { %7694 = vmatpush3.msra.mxu1 %v8384_v61  ;;  %7662 = vmatprep.subr.mxu0 %v8404_v6 }
 0x497   :  { %7695 = vmatprep.subr.mxu1 %v8394_v1  ;;  %7663 = vmatpush3.msra.mxu0 %v8404_v6 }
 0x498   :  { %7696 = vmatpush3.msra.mxu1 %v8394_v1  ;;  %7664 = vmatprep.subr.mxu0 %v8416_v45 }
 0x499   :  { %7697 = vmatprep.subr.mxu1 %v8406_v9  ;;  %7665 = vmatpush3.msra.mxu0 %v8416_v45 }
 0x49a   :  { %7698 = vmatpush3.msra.mxu1 %v8406_v9  ;;  %7667 = vmatmul.mubr.f32.vlgmr.msra.gmra.mxu0 %v2226_v2  ;;  %v3323_v2 = vand.u32 4294901760, %v3322_v55 }
 0x49b   :  { %7680 = vmatprep.subr.mxu0 %v8389_v63  ;;  %7700 = vmatmul.mubr.f32.vlgmr.msra.gmra.mxu1 %v2225_v56 }
 0x49c   :  { %7681 = vmatpush3.msra.mxu0 %v8389_v63  ;;  %7688 = vmatprep.mubr.f32.mxu0 %v2215_v62  ;;  %v8510_v62 = vand.u32 4294901760, %v3194_v54 }
 0x49d   :  { %7682 = vmatprep.subr.mxu0 %v8401_v4  ;;  %7713 = vmatprep.mubr.f32.mxu1 %v8227_v22 }
 0x49e   :  { %7683 = vmatpush3.msra.mxu0 %v8401_v4  ;;  %v8520_v35 = vsub.f32 %v3194_v54, %v8510_v62 }
 0x49f   :  { %7684 = vmatprep.subr.mxu0 %v8413_v18 }
 0x4a0   :  { %7685 = vmatpush3.msra.mxu0 %v8413_v18  ;;  %v8527_v48 = vand.u32 4294901760, %v8520_v35 }
 0x4a1   :  { %7686 = vmatprep.subr.mxu0 %v8423_v23 }
 0x4a2   :  { %7687 = vmatpush3.msra.mxu0 %v8423_v23 }
 0x4a3   :  { %7689 = vmatmul.mubr.f32.vlgmr.msra.gmra.mxu0 %v2225_v56  ;;  %v8505_v56 = vand.u32 4294901760, %v8496_v49 }
 0x4a4   :  { %7706 = vmatprep.mubr.f32.mxu0 %v8238_v37 }
 0x4a5   :  { %v3329_v3 = vsub.f32 %v8496_v49, %v8505_v56 }
 0x4a7   :  { %v3330_v38 = vand.u32 4294901760, %v3329_v3 }
 0x549   :  { %v7657_v59 = vpop.f32.mrf.mxu1 }
 0x54b   :  { %v2322_v0 = vpop.f32.mrf.mxu1 }
 0x551   :  { %v7679_v6 = vpop.f32.mrf.mxu1 }
 0x552   :  { %v7646_v57 = vpop.f32.mrf.mxu0 }
 0x553   :  { %v2329_v1 = vadd.f32 %v7657_v59, %v7646_v57  ;;  %v2492_v5 = vpop.f32.mrf.mxu1  ;;  %v3343_v57 = vsub.f32 %v8520_v35, %v8527_v48 }
 0x554   :  { %v2221_v61 = vpop.f32.mrf.mxu0 }
 0x555   :  { %v2323_v4 = vadd.f32 %v2322_v0, %v2221_v61  ;;  %v3344_v59 = vand.u32 4294901760, %v3343_v57 }
 0x55a   :  { %v7668_v63 = vpop.f32.mrf.mxu0 }
 0x55b   :  { %v2416_v45 = vadd.f32 %v7668_v63, %v2329_v1  ;;  %v7701_v7 = vpop.f32.mrf.mxu1 }
 0x55c   :  { %v2408_v9 = vpop.f32.mrf.mxu0 }
 0x55d   :  { %v2409_v24 = vadd.f32 %v2408_v9, %v2323_v4  ;;  %v2501_v18 = vadd.f32 %v7679_v6, %v2416_v45  ;;  %v2664_v17 = vpop.f32.mrf.mxu1 }
 0x55f   :  { %v2493_v23 = vadd.f32 %v2492_v5, %v2409_v24 }
 0x563   :  { %v7690_v8 = vpop.f32.mrf.mxu0 }
 0x564   :  { %v2590_v10 = vadd.f32 %v7690_v8, %v2501_v18 }
 0x565   :  { %v2583_v11 = vpop.f32.mrf.mxu0 }
 0x566   :  { %v8465_v12 = vadd.f32 %v7701_v7, %v2590_v10  ;;  %v2584_v16 = vadd.f32 %v2583_v11, %v2493_v23 }
 0x568   :  { %v8467_v15 = vadd.f32 %v2664_v17, %v2584_v16  ;;  %2678 = vrot.lane.b32.xlu0 %v8465_v12, %s8176_s30 }
 0x56a   :  { %2676 = vrot.lane.b32.xlu1 %v8467_v15, %s8176_s30 }
 0x5da   :  { %v2679_v21 = vpop.permute.xlu0 %2678 }
 0x5db   :  { %v2711_v27 = vand.u32 4294901760, %v2679_v21 }
 0x5dc   :  { %v2677_v29 = vpop.permute.xlu1 %2676 }
 0x5dd   :  { %v2799_v20 = vsub.f32 %v2679_v21, %v2711_v27  ;;  %v2714_v30 = vand.u32 4294901760, %v2677_v29  ;;  %7702 = vmatprep.subr.mxu0 %v2711_v27 }
 0x5de   :  { %7703 = vmatpush3.msra.mxu0 %v2711_v27 }
 0x5df   :  { %v2806_v31 = vsub.f32 %v2677_v29, %v2714_v30  ;;  %7704 = vmatprep.subr.mxu0 %v2714_v30  ;;  %v2800_v32 = vand.u32 4294901760, %v2799_v20  ;;  %v7092_v29 = vld [vmem:[#allocation5 + $0x6a] ss:$0 sm:$0xff] }
 0x5e0   :  { %7705 = vmatpush3.msra.mxu0 %v2714_v30 }
 0x5e1   :  { %7716 = vmatprep.subr.mxu0 %v2799_v20  ;;  %7707 = vmatmul.mubr.f32.vlgmr.msra.gmra.mxu0 %v8263_v60  ;;  %v2801_v26 = vsub.f32 %v2799_v20, %v2800_v32  ;;  %v2807_v33 = vand.u32 4294901760, %v2806_v31 }
 0x5e2   :  { %7717 = vmatpush3.msra.mxu0 %v2799_v20  ;;  %7720 = vmatprep.mubr.f32.mxu0 %v8230_v25 }
 0x5e3   :  { %7718 = vmatprep.subr.mxu0 %v2806_v31  ;;  %v2802_v34 = vand.u32 4294901760, %v2801_v26  ;;  %v2808_v36 = vsub.f32 %v2806_v31, %v2807_v33 }
 0x5e4   :  { %7719 = vmatpush3.msra.mxu0 %v2806_v31 }
 0x5e5   :  { %7709 = vmatprep.subr.mxu1 %v2802_v34  ;;  %7730 = vmatprep.subr.mxu0 %v2800_v32  ;;  %v2809_v39 = vand.u32 4294901760, %v2808_v36 }
 0x5e6   :  { %7710 = vmatpush3.msra.mxu1 %v2802_v34  ;;  %7721 = vmatmul.mubr.f32.vlgmr.msra.gmra.mxu0 %v8256_v52 }
 0x5e7   :  { %7731 = vmatpush3.msra.mxu0 %v2800_v32  ;;  %7711 = vmatprep.subr.mxu1 %v2809_v39 }
 0x5e8   :  { %7732 = vmatprep.subr.mxu0 %v2807_v33  ;;  %7712 = vmatpush3.msra.mxu1 %v2809_v39 }
 0x5e9   :  { %7733 = vmatpush3.msra.mxu0 %v2807_v33  ;;  %7714 = vmatmul.mubr.f32.vlgmr.msra.gmra.mxu1 %v8253_v51 }
 0x5ea   :  { %7723 = vmatprep.subr.mxu1 %v2711_v27  ;;  %7727 = vmatprep.mubr.f32.mxu1 %v8234_v28 }
 0x5eb   :  { %7724 = vmatpush3.msra.mxu1 %v2711_v27  ;;  %7734 = vmatprep.mubr.f32.mxu0 %v8227_v22 }
 0x5ec   :  { %7725 = vmatprep.subr.mxu1 %v2714_v30  ;;  %7735 = vmatmul.mubr.f32.vlgmr.msra.gmra.mxu0 %v8253_v51 }
 0x5ed   :  { %7726 = vmatpush3.msra.mxu1 %v2714_v30  ;;  %7744 = vmatprep.subr.mxu0 %v8483_v41 }
 0x5ee   :  { %7728 = vmatmul.mubr.f32.vlgmr.msra.gmra.mxu1 %v8259_v53  ;;  %7737 = vmatprep.subr.mxu1 %v2711_v27 }
 0x5ef   :  { %7738 = vmatpush3.msra.mxu1 %v2711_v27  ;;  %7741 = vmatprep.mubr.f32.mxu1 %v8227_v22 }
 0x5f0   :  { %7739 = vmatprep.subr.mxu1 %v2714_v30  ;;  %7745 = vmatpush3.msra.mxu0 %v8483_v41 }
 0x5f1   :  { %7740 = vmatpush3.msra.mxu1 %v2714_v30  ;;  %7746 = vmatprep.subr.mxu0 %v8488_v44 }
 0x5f2   :  { %7742 = vmatmul.mubr.f32.vlgmr.msra.gmra.mxu1 %v8253_v51  ;;  %7747 = vmatpush3.msra.mxu0 %v8488_v44 }
 0x5f3   :  { %7748 = vmatprep.subr.mxu0 %v8498_v50  ;;  %7755 = vmatprep.subr.mxu1 %v3323_v2 }
 0x5f4   :  { %7749 = vmatpush3.msra.mxu0 %v8498_v50  ;;  %7756 = vmatpush3.msra.mxu1 %v3323_v2 }
 0x5f5   :  { %7750 = vmatprep.subr.mxu0 %v8510_v62  ;;  %7757 = vmatprep.subr.mxu1 %v3330_v38 }
 0x5f6   :  { %7751 = vmatpush3.msra.mxu0 %v8510_v62  ;;  %7758 = vmatpush3.msra.mxu1 %v3330_v38 }
 0x5f7   :  { %7766 = vmatprep.subr.mxu0 %v8486_v43  ;;  %7759 = vmatprep.subr.mxu1 %v3337_v19 }
 0x5f8   :  { %7760 = vmatpush3.msra.mxu1 %v3337_v19 }
 0x5f9   :  { %7761 = vmatprep.subr.mxu1 %v3344_v59 }
 0x5fa   :  { %7762 = vmatpush3.msra.mxu1 %v3344_v59 }
 0x5fb   :  { %7777 = vmatprep.subr.mxu1 %v8483_v41 }
 0x6a1   :  { %v7708_v61 = vpop.f32.mrf.mxu0 }
 0x6a3   :  { %v2755_v63 = vpop.f32.mrf.mxu0 }
 0x6a6   :  { %v7722_v0 = vpop.f32.mrf.mxu0 }
 0x6a8   :  { %v2928_v9 = vpop.f32.mrf.mxu0 }
 0x6a9   :  { %v7715_v1 = vpop.f32.mrf.mxu1 }
 0x6aa   :  { %v2853_v6 = vadd.f32 %v7715_v1, %v7708_v61 }
 0x6ab   :  { %v2846_v4 = vpop.f32.mrf.mxu1 }
 0x6ac   :  { %v2936_v45 = vadd.f32 %v7722_v0, %v2853_v6  ;;  %v2847_v24 = vadd.f32 %v2846_v4, %v2755_v63  ;;  %v7736_v7 = vpop.f32.mrf.mxu0 }
 0x6ae   :  { %v2929_v5 = vadd.f32 %v2928_v9, %v2847_v24  ;;  %v7729_v18 = vpop.f32.mrf.mxu1  ;;  %v3095_v16 = vpop.f32.mrf.mxu0 }
 0x6af   :  { %v3019_v8 = vadd.f32 %v7729_v18, %v2936_v45 }
 0x6b0   :  { %v3010_v10 = vpop.f32.mrf.mxu1 }
 0x6b1   :  { %v3102_v23 = vadd.f32 %v7736_v7, %v3019_v8  ;;  %v3011_v11 = vadd.f32 %v3010_v10, %v2929_v5 }
 0x6b2   :  { %v7743_v17 = vpop.f32.mrf.mxu1 }
 0x6b3   :  { %v3096_v21 = vadd.f32 %v3095_v16, %v3011_v11  ;;  %v3181_v27 = vadd.f32 %v7743_v17, %v3102_v23 }
 0x6b4   :  { %v3174_v20 = vpop.f32.mrf.mxu1 }
 0x6b5   :  { %v3185_v30 = vadd.f32 %v3181_v27, %v8465_v12  ;;  %v3175_v31 = vadd.f32 %v3174_v20, %v3096_v21 }
 0x6b7   :  { %v3191_v32 = vadd.f32 %v7092_v29, %v3185_v30  ;;  %v3184_v26 = vadd.f32 %v3175_v31, %v8467_v15 }
 0x6b9   :  { %v3193_v33 = vmax.f32 %v3191_v32, 0.0  ;;  %v3190_v34 = vadd.f32 %v7092_v29, %v3184_v26 }
 0x6bb   :  { %v3203_v36 = vsel %vm1080_vm2, %v3193_v33, 0  ;;  %v3192_v39 = vmax.f32 %v3190_v34, 0.0 }
 0x6bc   :  { %v3284_v40 = vand.u32 4294901760, %v3203_v36 }
 0x6bd   :  { %v3200_v42 = vsel %vm1080_vm2, %v3192_v39, 0 }
 0x6be   :  { %v3274_v46 = vand.u32 4294901760, %v3200_v42  ;;  %v3285_v54 = vsub.f32 %v3203_v36, %v3284_v40 }
 0x6c0   :  { %7763 = vmatprep.mubr.f32.mxu1 %v3274_v46  ;;  %v3275_v55 = vsub.f32 %v3200_v42, %v3274_v46  ;;  %v3286_v2 = vand.u32 4294901760, %v3285_v54  ;;  %v7093_v42 = vld [vmem:[#allocation5 + $0x6b] ss:$0 sm:$0xff] }
 0x6c1   :  { %7764 = vmatmul.mubr.f32.vlgmr.msra.gmra.mxu1 %v3284_v40 }
 0x6c2   :  { %7778 = vmatpush3.msra.mxu1 %v8483_v41  ;;  %v3276_v12 = vand.u32 4294901760, %v3275_v55  ;;  %v3287_v3 = vsub.f32 %v3285_v54, %v3286_v2 }
 0x6c3   :  { %7779 = vmatprep.subr.mxu1 %v8488_v44 }
 0x6c4   :  { %7780 = vmatpush3.msra.mxu1 %v8488_v44  ;;  %7785 = vmatprep.mubr.f32.mxu1 %v3276_v12  ;;  %v3277_v15 = vsub.f32 %v3275_v55, %v3276_v12  ;;  %v3288_v14 = vand.u32 4294901760, %v3287_v3 }
 0x6c5   :  { %7781 = vmatprep.subr.mxu1 %v8498_v50 }
 0x6c6   :  { %7782 = vmatpush3.msra.mxu1 %v8498_v50  ;;  %v3278_v38 = vand.u32 4294901760, %v3277_v15 }
 0x6c7   :  { %7783 = vmatprep.subr.mxu1 %v8510_v62 }
 0x6c8   :  { %7784 = vmatpush3.msra.mxu1 %v8510_v62  ;;  %7752 = vmatprep.mubr.f32.mxu0 %v3278_v38 }
 0x6c9   :  { %7786 = vmatmul.mubr.f32.vlgmr.msra.gmra.mxu1 %v3286_v2  ;;  %7799 = vmatprep.subr.mxu1 %v8483_v41 }
 0x6ca   :  { %7753 = vmatmul.mubr.f32.vlgmr.msra.gmra.mxu0 %v3288_v14  ;;  %7800 = vmatpush3.msra.mxu1 %v8483_v41 }
 0x6cb   :  { %7767 = vmatpush3.msra.mxu0 %v8486_v43  ;;  %7807 = vmatprep.mubr.f32.mxu1 %v3274_v46 }
 0x6cc   :  { %7768 = vmatprep.subr.mxu0 %v8496_v49  ;;  %7774 = vmatprep.mubr.f32.mxu0 %v3275_v55 }
 0x6cd   :  { %7801 = vmatprep.subr.mxu1 %v8488_v44  ;;  %7769 = vmatpush3.msra.mxu0 %v8496_v49 }
 0x6ce   :  { %7802 = vmatpush3.msra.mxu1 %v8488_v44  ;;  %7770 = vmatprep.subr.mxu0 %v8508_v58 }
 0x6cf   :  { %7803 = vmatprep.subr.mxu1 %v8498_v50  ;;  %7771 = vmatpush3.msra.mxu0 %v8508_v58 }
 0x6d0   :  { %7804 = vmatpush3.msra.mxu1 %v8498_v50  ;;  %7772 = vmatprep.subr.mxu0 %v8520_v35 }
 0x6d1   :  { %7805 = vmatprep.subr.mxu1 %v8510_v62  ;;  %7773 = vmatpush3.msra.mxu0 %v8520_v35 }
 0x6d2   :  { %7806 = vmatpush3.msra.mxu1 %v8510_v62  ;;  %7775 = vmatmul.mubr.f32.vlgmr.msra.gmra.mxu0 %v3285_v54 }
 0x6d3   :  { %7788 = vmatprep.subr.mxu0 %v8493_v47  ;;  %7808 = vmatmul.mubr.f32.vlgmr.msra.gmra.mxu1 %v3284_v40 }
 0x6d4   :  { %7789 = vmatpush3.msra.mxu0 %v8493_v47  ;;  %7796 = vmatprep.mubr.f32.mxu0 %v3274_v46 }
 0x6d5   :  { %7790 = vmatprep.subr.mxu0 %v8505_v56  ;;  %7821 = vmatprep.mubr.f32.mxu1 %v8227_v22 }
 0x6d6   :  { %7791 = vmatpush3.msra.mxu0 %v8505_v56 }
 0x6d7   :  { %7792 = vmatprep.subr.mxu0 %v8517_v13 }
 0x6d8   :  { %7793 = vmatpush3.msra.mxu0 %v8517_v13 }
 0x6d9   :  { %7794 = vmatprep.subr.mxu0 %v8527_v48 }
 0x6da   :  { %7795 = vmatpush3.msra.mxu0 %v8527_v48 }
 0x6db   :  { %7797 = vmatmul.mubr.f32.vlgmr.msra.gmra.mxu0 %v3284_v40 }
 0x6dc   :  { %7814 = vmatprep.mubr.f32.mxu0 %v8238_v37 }
 0x781   :  { %v7765_v43 = vpop.f32.mrf.mxu1 }
 0x783   :  { %v3381_v49 = vpop.f32.mrf.mxu1 }
 0x789   :  { %v7787_v58 = vpop.f32.mrf.mxu1 }
 0x78a   :  { %v7754_v41 = vpop.f32.mrf.mxu0 }
 0x78b   :  { %v3388_v50 = vadd.f32 %v7765_v43, %v7754_v41  ;;  %v3551_v57 = vpop.f32.mrf.mxu1  ;;  %v4252_v43 = vld [vmem:[#allocation2 + $0x8] sm:$0xff] }
 0x78c   :  { %v3280_v44 = vpop.f32.mrf.mxu0 }
 0x78d   :  { %v3382_v56 = vadd.f32 %v3381_v49, %v3280_v44 }
 0x792   :  { %v7776_v47 = vpop.f32.mrf.mxu0 }
 0x793   :  { %v3475_v35 = vadd.f32 %v7776_v47, %v3388_v50  ;;  %v7809_v59 = vpop.f32.mrf.mxu1  ;;  %v4251_v47 = vld [vmem:[#allocation2] sm:$0xff] }
 0x794   :  { %v3467_v62 = vpop.f32.mrf.mxu0 }
 0x795   :  { %v3468_v19 = vadd.f32 %v3467_v62, %v3382_v56  ;;  %v3560_v13 = vadd.f32 %v7787_v58, %v3475_v35  ;;  %v3723_v6 = vpop.f32.mrf.mxu1 }
 0x797   :  { %v3552_v48 = vadd.f32 %v3551_v57, %v3468_v19 }
 0x79b   :  { %v7798_v61 = vpop.f32.mrf.mxu0 }
 0x79c   :  { %v3649_v63 = vadd.f32 %v7798_v61, %v3560_v13 }
 0x79d   :  { %v3642_v0 = vpop.f32.mrf.mxu0 }
 0x79e   :  { %v8569_v1 = vadd.f32 %v7809_v59, %v3649_v63  ;;  %v3643_v37 = vadd.f32 %v3642_v0, %v3552_v48 }
 0x7a0   :  { %v8571_v9 = vadd.f32 %v3723_v6, %v3643_v37  ;;  %3737 = vrot.lane.b32.xlu0 %v8569_v1, %s8177_s0 }
 0x7a2   :  { %3735 = vrot.lane.b32.xlu1 %v8571_v9, %s8177_s0 }
 0x812   :  { %v3738_v4 = vpop.permute.xlu0 %3737 }
 0x813   :  { %v3770_v45 = vand.u32 4294901760, %v3738_v4 }
 0x814   :  { %v3736_v24 = vpop.permute.xlu1 %3735 }
 0x815   :  { %v3858_v5 = vsub.f32 %v3738_v4, %v3770_v45  ;;  %v3773_v18 = vand.u32 4294901760, %v3736_v24  ;;  %7810 = vmatprep.subr.mxu0 %v3770_v45 }
 0x816   :  { %7811 = vmatpush3.msra.mxu0 %v3770_v45 }
 0x817   :  { %v3865_v7 = vsub.f32 %v3736_v24, %v3773_v18  ;;  %7812 = vmatprep.subr.mxu0 %v3773_v18  ;;  %v3859_v8 = vand.u32 4294901760, %v3858_v5 }
 0x818   :  { %7813 = vmatpush3.msra.mxu0 %v3773_v18 }
 0x819   :  { %7824 = vmatprep.subr.mxu0 %v3858_v5  ;;  %7815 = vmatmul.mubr.f32.vlgmr.msra.gmra.mxu0 %v8263_v60  ;;  %v3860_v10 = vsub.f32 %v3858_v5, %v3859_v8  ;;  %v3866_v23 = vand.u32 4294901760, %v3865_v7 }
 0x81a   :  { %7825 = vmatpush3.msra.mxu0 %v3858_v5  ;;  %7828 = vmatprep.mubr.f32.mxu0 %v8230_v25 }
 0x81b   :  { %7826 = vmatprep.subr.mxu0 %v3865_v7  ;;  %v3861_v11 = vand.u32 4294901760, %v3860_v10  ;;  %v3867_v16 = vsub.f32 %v3865_v7, %v3866_v23 }
 0x81c   :  { %7827 = vmatpush3.msra.mxu0 %v3865_v7 }
 0x81d   :  { %7817 = vmatprep.subr.mxu1 %v3861_v11  ;;  %7838 = vmatprep.subr.mxu0 %v3859_v8  ;;  %v3868_v17 = vand.u32 4294901760, %v3867_v16 }
 0x81e   :  { %7818 = vmatpush3.msra.mxu1 %v3861_v11  ;;  %7829 = vmatmul.mubr.f32.vlgmr.msra.gmra.mxu0 %v8256_v52 }
 0x81f   :  { %7839 = vmatpush3.msra.mxu0 %v3859_v8  ;;  %7819 = vmatprep.subr.mxu1 %v3868_v17 }
 0x820   :  { %7840 = vmatprep.subr.mxu0 %v3866_v23  ;;  %7820 = vmatpush3.msra.mxu1 %v3868_v17 }
 0x821   :  { %7841 = vmatpush3.msra.mxu0 %v3866_v23  ;;  %7822 = vmatmul.mubr.f32.vlgmr.msra.gmra.mxu1 %v8253_v51 }
 0x822   :  { %7831 = vmatprep.subr.mxu1 %v3770_v45  ;;  %7835 = vmatprep.mubr.f32.mxu1 %v8234_v28 }
 0x823   :  { %7832 = vmatpush3.msra.mxu1 %v3770_v45  ;;  %7842 = vmatprep.mubr.f32.mxu0 %v8227_v22 }
 0x824   :  { %7833 = vmatprep.subr.mxu1 %v3773_v18  ;;  %7843 = vmatmul.mubr.f32.vlgmr.msra.gmra.mxu0 %v8253_v51 }
 0x825   :  { %7834 = vmatpush3.msra.mxu1 %v3773_v18 }
 0x826   :  { %7836 = vmatmul.mubr.f32.vlgmr.msra.gmra.mxu1 %v8259_v53  ;;  %7845 = vmatprep.subr.mxu1 %v3770_v45 }
 0x827   :  { %7846 = vmatpush3.msra.mxu1 %v3770_v45  ;;  %7849 = vmatprep.mubr.f32.mxu1 %v8227_v22 }
 0x828   :  { %7847 = vmatprep.subr.mxu1 %v3773_v18 }
 0x829   :  { %7848 = vmatpush3.msra.mxu1 %v3773_v18 }
 0x82a   :  { %7850 = vmatmul.mubr.f32.vlgmr.msra.gmra.mxu1 %v8253_v51 }
 0x8d9   :  { %v7816_v25 = vpop.f32.mrf.mxu0 }
 0x8db   :  { %v3814_v52 = vpop.f32.mrf.mxu0 }
 0x8de   :  { %v7830_v28 = vpop.f32.mrf.mxu0 }
 0x8e0   :  { %v3987_v27 = vpop.f32.mrf.mxu0 }
 0x8e1   :  { %v7823_v60 = vpop.f32.mrf.mxu1 }
 0x8e2   :  { %v3912_v21 = vadd.f32 %v7823_v60, %v7816_v25 }
 0x8e3   :  { %v3905_v29 = vpop.f32.mrf.mxu1 }
 0x8e4   :  { %v3995_v20 = vadd.f32 %v7830_v28, %v3912_v21  ;;  %v3906_v30 = vadd.f32 %v3905_v29, %v3814_v52  ;;  %v7844_v53 = vpop.f32.mrf.mxu0 }
 0x8e6   :  { %v3988_v31 = vadd.f32 %v3987_v27, %v3906_v30  ;;  %v7837_v32 = vpop.f32.mrf.mxu1  ;;  %v4154_v36 = vpop.f32.mrf.mxu0 }
 0x8e7   :  { %v4078_v26 = vadd.f32 %v7837_v32, %v3995_v20 }
 0x8e8   :  { %v4069_v33 = vpop.f32.mrf.mxu1 }
 0x8e9   :  { %v4161_v34 = vadd.f32 %v7844_v53, %v4078_v26  ;;  %v4070_v22 = vadd.f32 %v4069_v33, %v3988_v31 }
 0x8ea   :  { %v7851_v39 = vpop.f32.mrf.mxu1 }
 0x8eb   :  { %v4155_v40 = vadd.f32 %v4154_v36, %v4070_v22  ;;  %v4240_v51 = vadd.f32 %v7851_v39, %v4161_v34 }
 0x8ec   :  { %v4233_v46 = vpop.f32.mrf.mxu1 }
 0x8ed   :  { %v4244_v54 = vadd.f32 %v4240_v51, %v8569_v1  ;;  %v4234_v55 = vadd.f32 %v4233_v46, %v4155_v40 }
 0x8ef   :  { %v4250_v2 = vadd.f32 %v7093_v42, %v4244_v54  ;;  %v4243_v12 = vadd.f32 %v4234_v55, %v8571_v9 }
 0x8f1   :  { %v4255_v15 = vmul.f32 1.442695, %v4250_v2  ;;  %v4249_v3 = vadd.f32 %v7093_v42, %v4243_v12 }
 0x8f3   :  { %8070 = vpow2.f32 %v4255_v15  ;;  %v4253_v38 = vmul.f32 1.442695, %v4249_v3 }
 0x8f5   :  { %8072 = vpow2.f32 %v4253_v38 }
 0x900   :  { %v8071_v14 = vpop.eup %8070 }
 0x901   :  { %4261 = vrot.lane.b32.xlu1 %v8071_v14, %s8176_s30  ;;  %v4786_v14 = vld [vmem:[#allocation5 + $0x78] sm:$0xff] }
 0x902   :  { %v8073_v41 = vpop.eup %8072 }
 0x903   :  { %4259 = vrot.lane.b32.xlu0 %v8073_v41, %s8176_s30  ;;  %v8597_v41 = vand.u32 4294901760, %v4786_v14 }
 0x973   :  { %v4262_v44 = vpop.permute.xlu1 %4261 }
 0x974   :  { %v4266_v49 = vmul.f32 %v4262_v44, %v4252_v43  ;;  %v8600_v43 = vsub.f32 %v4786_v14, %v8597_v41 }
 0x975   :  { %v4260_v50 = vpop.permute.xlu0 %4259 }
 0x976   :  { %v4268_v58 = vadd.f32 %v4266_v49, %v4250_v2  ;;  %v4265_v62 = vmul.f32 %v4260_v50, %v4251_v47  ;;  %v8605_v44 = vand.u32 4294901760, %v8600_v43  ;;  %v4785_v50 = vld [vmem:[#allocation5 + $0x70] sm:$0xff] }
 0x978   :  { %v4281_v56 = vsel %vm556_vm1, %v4268_v58, 0  ;;  %v4267_v35 = vadd.f32 %v4265_v62, %v4249_v3  ;;  %4273 = vrot.lane.b32.xlu1 %v4268_v58, %s8178_s7  ;;  %v4962_v47 = vsub.f32 %v8600_v43, %v8605_v44  ;;  %v4875_v58 = vand.u32 4294901760, %v4785_v50 }
 0x979   :  { %v4312_v19 = vand.u32 4294901760, %v4281_v56 }
 0x97a   :  { %v4279_v57 = vsel %vm556_vm1, %v4267_v35, 0  ;;  %4271 = vrot.lane.b32.xlu0 %v4267_v35, %s8178_s7  ;;  %v4963_v49 = vand.u32 4294901760, %v4962_v47  ;;  %v8609_v62 = vsub.f32 %v4785_v50, %v4875_v58 }
 0x97b   :  { %v4400_v13 = vsub.f32 %v4281_v56, %v4312_v19  ;;  %v4315_v59 = vand.u32 4294901760, %v4279_v57  ;;  %7852 = vmatprep.subr.mxu0 %v4312_v19 }
 0x97c   :  { %7853 = vmatpush3.xpose.msra.mxu0 %v4312_v19  ;;  %v8612_v56 = vand.u32 4294901760, %v8609_v62 }
 0x97d   :  { %v4407_v61 = vsub.f32 %v4279_v57, %v4315_v59  ;;  %7854 = vmatprep.subr.mxu0 %v4315_v59  ;;  %v4401_v63 = vand.u32 4294901760, %v4400_v13 }
 0x97e   :  { %v4969_v35 = vsub.f32 %v8609_v62, %v8612_v56 }
 0x97f   :  { %v4402_v48 = vsub.f32 %v4400_v13, %v4401_v63  ;;  %v4408_v0 = vand.u32 4294901760, %v4407_v61 }
 0x980   :  { %7855 = vmatpush3.xpose.msra.mxu0 %v4315_v59 }
 0x981   :  { %7866 = vmatprep.subr.mxu0 %v4400_v13  ;;  %v4403_v1 = vand.u32 4294901760, %v4402_v48  ;;  %v4409_v37 = vsub.f32 %v4407_v61, %v4408_v0 }
 0x983   :  { %7859 = vmatprep.subr.mxu1 %v4403_v1  ;;  %v4410_v6 = vand.u32 4294901760, %v4409_v37 }
 0x984   :  { %7860 = vmatpush3.xpose.msra.mxu1 %v4403_v1 }
 0x985   :  { %7861 = vmatprep.subr.mxu1 %v4410_v6 }
 0x988   :  { %7862 = vmatpush3.xpose.msra.mxu1 %v4410_v6 }
 0x989   :  { %7873 = vmatprep.subr.mxu1 %v4312_v19 }
 0x9ea   :  { %v4274_v9 = vpop.permute.xlu1 %4273 }
 0x9eb   :  { %v4277_v4 = vsel %vm556_vm1, %v4274_v9, 0 }
 0x9ec   :  { %v4360_v45 = vand.u32 4294901760, %v4277_v4  ;;  %v4272_v24 = vpop.permute.xlu0 %4271 }
 0x9ed   :  { %v4275_v5 = vsel %vm556_vm1, %v4272_v24, 0 }
 0x9ee   :  { %v4361_v18 = vsub.f32 %v4277_v4, %v4360_v45  ;;  %v4350_v7 = vand.u32 4294901760, %v4275_v5 }
 0x9f0   :  { %v4362_v8 = vand.u32 4294901760, %v4361_v18  ;;  %v4351_v10 = vsub.f32 %v4275_v5, %v4350_v7  ;;  %7863 = vmatprep.mubr.f32.mxu1 %v4350_v7 }
 0x9f1   :  { %7864 = vmatmul.mubr.f32.vlgmr.msra.gmra.mxu1 %v4360_v45 }
 0x9f2   :  { %7874 = vmatpush3.xpose.msra.mxu1 %v4312_v19  ;;  %v4352_v23 = vand.u32 4294901760, %v4351_v10  ;;  %v4363_v11 = vsub.f32 %v4361_v18, %v4362_v8 }
 0x9f3   :  { %7875 = vmatprep.subr.mxu1 %v4315_v59 }
 0x9f4   :  { %7877 = vmatprep.mubr.f32.mxu1 %v4352_v23  ;;  %v4353_v16 = vsub.f32 %v4351_v10, %v4352_v23  ;;  %v4364_v25 = vand.u32 4294901760, %v4363_v11 }
 0x9f6   :  { %7876 = vmatpush3.xpose.msra.mxu1 %v4315_v59  ;;  %v4354_v17 = vand.u32 4294901760, %v4353_v16 }
 0x9f7   :  { %7887 = vmatprep.subr.mxu1 %v4312_v19 }
 0x9f8   :  { %7856 = vmatprep.mubr.f32.mxu0 %v4354_v17 }
 0x9f9   :  { %7878 = vmatmul.mubr.f32.vlgmr.msra.gmra.mxu1 %v4362_v8  ;;  %7857 = vmatmul.mubr.f32.vlgmr.msra.gmra.mxu0 %v4364_v25 }
 0x9fa   :  { %7867 = vmatpush3.xpose.msra.mxu0 %v4400_v13  ;;  %7888 = vmatpush3.xpose.msra.mxu1 %v4312_v19  ;;  %v4970_v19 = vand.u32 4294901760, %v4969_v35 }
 0x9fb   :  { %7891 = vmatprep.mubr.f32.mxu1 %v4350_v7  ;;  %7868 = vmatprep.subr.mxu0 %v4407_v61 }
 0x9fc   :  { %7870 = vmatprep.mubr.f32.mxu0 %v4351_v10  ;;  %7889 = vmatprep.subr.mxu1 %v4315_v59  ;;  %v7095_v10 = vld [vmem:[#allocation5 + $0xb4] ss:$0 sm:$0xff] }
 0x9fe   :  { %7869 = vmatpush3.xpose.msra.mxu0 %v4407_v61  ;;  %7890 = vmatpush3.xpose.msra.mxu1 %v4315_v59 }
 0x9ff   :  { %7880 = vmatprep.subr.mxu0 %v4401_v63  ;;  %7901 = vmatprep.subr.mxu1 %v4963_v49 }
 0xa01   :  { %7871 = vmatmul.mubr.f32.vlgmr.msra.gmra.mxu0 %v4361_v18  ;;  %7892 = vmatmul.mubr.f32.vlgmr.msra.gmra.mxu1 %v4360_v45 }
 0xa02   :  { %7881 = vmatpush3.xpose.msra.mxu0 %v4401_v63  ;;  %7884 = vmatprep.mubr.f32.mxu0 %v4350_v7  ;;  %v7094_v7 = vld [vmem:[#allocation5 + $0xb0] ss:$0 sm:$0xff] }
 0xa03   :  { %7882 = vmatprep.subr.mxu0 %v4408_v0  ;;  %7902 = vmatpush3.msra.mxu1 %v4963_v49 }
 0xa04   :  { %7903 = vmatprep.subr.mxu1 %v4970_v19 }
 0xa05   :  { %7904 = vmatpush3.msra.mxu1 %v4970_v19 }
 0xa06   :  { %7883 = vmatpush3.xpose.msra.mxu0 %v4408_v0  ;;  %7915 = vmatprep.subr.mxu1 %v8597_v41 }
 0xa07   :  { %7894 = vmatprep.subr.mxu0 %v8597_v41 }
 0xa09   :  { %7885 = vmatmul.mubr.f32.vlgmr.msra.gmra.mxu0 %v4360_v45 }
 0xa0a   :  { %7895 = vmatpush3.msra.mxu0 %v8597_v41 }
 0xa0b   :  { %7896 = vmatprep.subr.mxu0 %v4875_v58 }
 0xa0c   :  { %7897 = vmatpush3.msra.mxu0 %v4875_v58 }
 0xa0d   :  { %7908 = vmatprep.subr.mxu0 %v8600_v43 }
 0xab1   :  { %v7865_v28 = vpop.f32.mrf.mxu1 }
 0xab3   :  { %v4447_v21 = vpop.f32.mrf.mxu1 }
 0xab9   :  { %v7858_v52 = vpop.f32.mrf.mxu0  ;;  %v7879_v20 = vpop.f32.mrf.mxu1 }
 0xaba   :  { %v4454_v29 = vadd.f32 %v7865_v28, %v7858_v52 }
 0xabb   :  { %v4356_v60 = vpop.f32.mrf.mxu0  ;;  %v4611_v26 = vpop.f32.mrf.mxu1 }
 0xabc   :  { %v4448_v31 = vadd.f32 %v4447_v21, %v4356_v60 }
 0xac1   :  { %v7872_v27 = vpop.f32.mrf.mxu0  ;;  %v7893_v34 = vpop.f32.mrf.mxu1 }
 0xac2   :  { %v4537_v32 = vadd.f32 %v7872_v27, %v4454_v29 }
 0xac3   :  { %v4529_v30 = vpop.f32.mrf.mxu0  ;;  %v4775_v46 = vpop.f32.mrf.mxu1 }
 0xac4   :  { %v4530_v53 = vadd.f32 %v4529_v30, %v4448_v31  ;;  %v4620_v33 = vadd.f32 %v7879_v20, %v4537_v32 }
 0xac6   :  { %v4612_v39 = vadd.f32 %v4611_v26, %v4530_v53 }
 0xac9   :  { %v7886_v22 = vpop.f32.mrf.mxu0 }
 0xaca   :  { %v4703_v36 = vadd.f32 %v7886_v22, %v4620_v33 }
 0xacb   :  { %v4696_v40 = vpop.f32.mrf.mxu0 }
 0xacc   :  { %v4782_v51 = vadd.f32 %v7893_v34, %v4703_v36  ;;  %v4697_v42 = vadd.f32 %v4696_v40, %v4612_v39  ;;  %v7096_v39 = vld [vmem:[#allocation5 + $0xb8] ss:$0 sm:$0xff] }
 0xace   :  { %v4776_v54 = vadd.f32 %v4775_v46, %v4697_v42  ;;  %v4793_v55 = vsel %vm556_vm1, %v4782_v51, 0.0  ;;  %v4800_v3 = vmul.f32 %v4782_v51, %v4782_v51 }
 0xacf   :  { %4794 = vadd.xlane.f32.xlu1 %v4793_v55 }
 0xad0   :  { %v4790_v2 = vsel %vm556_vm1, %v4776_v54, 0.0  ;;  %v4799_v12 = vmul.f32 %v4776_v54, %v4776_v54  ;;  %v4804_v38 = vsel %vm556_vm1, %v4800_v3, 0.0 }
 0xad1   :  { %4791 = vadd.xlane.f32.xlu0 %v4790_v2 }
 0xad2   :  { %v4801_v15 = vsel %vm556_vm1, %v4799_v12, 0.0 }
 0xad5   :  { %4802 = vadd.xlane.f32.xlu0 %v4801_v15 }
 0xad9   :  { %4805 = vadd.xlane.f32.xlu0 %v4804_v38 }
 0xb58   :  { %v4795_v59 = vpop.xlane.xlu1 %4794 }
 0xb59   :  { %v4798_v63 = vmul.f32 0.0625, %v4795_v59 }
 0xb5a   :  { %v4792_v57 = vpop.xlane.xlu0 %4791 }
 0xb5b   :  { %v4797_v13 = vmul.f32 0.0625, %v4792_v57  ;;  %v4812_v6 = vmul.f32 %v4798_v63, %v4798_v63  ;;  %v4810_v23 = vsub.f32 %v4782_v51, %v4798_v63 }
 0xb5d   :  { %v4811_v48 = vmul.f32 %v4797_v13, %v4797_v13  ;;  %v4809_v5 = vsub.f32 %v4776_v54, %v4797_v13 }
 0xb5e   :  { %v4803_v61 = vpop.xlane.xlu0 %4802 }
 0xb5f   :  { %v4807_v0 = vmul.f32 0.0625, %v4803_v61 }
 0xb61   :  { %v4813_v1 = vsub.f32 %v4807_v0, %v4811_v48 }
 0xb62   :  { %v4806_v37 = vpop.xlane.xlu0 %4805 }
 0xb63   :  { %v4815_v9 = vadd.f32 1e-05, %v4813_v1  ;;  %v4808_v4 = vmul.f32 0.0625, %v4806_v37 }
 0xb65   :  { %8074 = vrsqrt.f32 %v4815_v9  ;;  %v4814_v45 = vsub.f32 %v4808_v4, %v4812_v6 }
 0xb67   :  { %v4816_v24 = vadd.f32 1e-05, %v4814_v45 }
 0xb69   :  { %8076 = vrsqrt.f32 %v4816_v24 }
 0xb72   :  { %v8075_v18 = vpop.eup %8074 }
 0xb73   :  { %v4819_v8 = vmul.f32 %v8075_v18, %v4809_v5  ;;  %v5358_v18 = vld [vmem:[#allocation5 + $0x88] sm:$0xff] }
 0xb75   :  { %v4825_v11 = vmul.f32 %v7094_v7, %v4819_v8  ;;  %v8634_v8 = vand.u32 4294901760, %v5358_v18 }
 0xb76   :  { %v8077_v16 = vpop.eup %8076 }
 0xb77   :  { %v4831_v17 = vadd.f32 %v7095_v10, %v4825_v11  ;;  %v4820_v25 = vmul.f32 %v8077_v16, %v4810_v23  ;;  %v8639_v23 = vsub.f32 %v5358_v18, %v8634_v8 }
 0xb79   :  { %v4838_v52 = vsel %vm556_vm1, %v4831_v17, 0  ;;  %v4826_v28 = vmul.f32 %v7094_v7, %v4820_v25  ;;  %v5357_v7 = vld [vmem:[#allocation5 + $0x80] sm:$0xff]  ;;  %v8647_v16 = vand.u32 4294901760, %v8639_v23 }
 0xb7a   :  { %v4910_v60 = vand.u32 4294901760, %v4838_v52 }
 0xb7b   :  { %v4832_v21 = vadd.f32 %v7095_v10, %v4826_v28  ;;  %v8636_v10 = vand.u32 4294901760, %v5357_v7  ;;  %v5533_v25 = vsub.f32 %v8639_v23, %v8647_v16 }
 0xb7c   :  { %7905 = vmatprep.mubr.f32.mxu1 %v4910_v60  ;;  %v4911_v27 = vsub.f32 %v4838_v52, %v4910_v60 }
 0xb7d   :  { %v4841_v29 = vsel %vm556_vm1, %v4832_v21, 0  ;;  %v8642_v11 = vsub.f32 %v5357_v7, %v8636_v10  ;;  %v5534_v28 = vand.u32 4294901760, %v5533_v25 }
 0xb7e   :  { %v4920_v20 = vand.u32 4294901760, %v4841_v29  ;;  %v4912_v30 = vand.u32 4294901760, %v4911_v27 }
 0xb7f   :  { %v8650_v17 = vand.u32 4294901760, %v8642_v11 }
 0xb80   :  { %v4921_v31 = vsub.f32 %v4841_v29, %v4920_v20  ;;  %7906 = vmatmul.mubr.f32.vlgmr.msra.gmra.mxu1 %v4920_v20  ;;  %v4913_v32 = vsub.f32 %v4911_v27, %v4912_v30 }
 0xb81   :  { %7916 = vmatpush3.msra.mxu1 %v8597_v41  ;;  %7919 = vmatprep.mubr.f32.mxu1 %v4912_v30  ;;  %v5540_v52 = vsub.f32 %v8642_v11, %v8650_v17 }
 0xb82   :  { %7917 = vmatprep.subr.mxu1 %v4875_v58  ;;  %v4914_v53 = vand.u32 4294901760, %v4913_v32  ;;  %v4922_v26 = vand.u32 4294901760, %v4921_v31 }
 0xb83   :  { %7918 = vmatpush3.msra.mxu1 %v4875_v58 }
 0xb84   :  { %7898 = vmatprep.mubr.f32.mxu0 %v4914_v53  ;;  %7920 = vmatmul.mubr.f32.vlgmr.msra.gmra.mxu1 %v4922_v26  ;;  %v4923_v33 = vsub.f32 %v4921_v31, %v4922_v26 }
 0xb85   :  { %7929 = vmatprep.subr.mxu1 %v8597_v41  ;;  %7933 = vmatprep.mubr.f32.mxu1 %v4910_v60 }
 0xb86   :  { %7930 = vmatpush3.msra.mxu1 %v8597_v41  ;;  %v4924_v34 = vand.u32 4294901760, %v4923_v33 }
 0xb87   :  { %7931 = vmatprep.subr.mxu1 %v4875_v58 }
 0xb88   :  { %7932 = vmatpush3.msra.mxu1 %v4875_v58  ;;  %7899 = vmatmul.mubr.f32.vlgmr.msra.gmra.mxu0 %v4924_v34 }
 0xb89   :  { %7934 = vmatmul.mubr.f32.vlgmr.msra.gmra.mxu1 %v4920_v20  ;;  %7909 = vmatpush3.msra.mxu0 %v8600_v43 }
 0xb8a   :  { %7912 = vmatprep.mubr.f32.mxu0 %v4911_v27  ;;  %7910 = vmatprep.subr.mxu0 %v8609_v62 }
 0xb8b   :  { %7911 = vmatpush3.msra.mxu0 %v8609_v62  ;;  %7943 = vmatprep.subr.mxu1 %v5534_v28 }
 0xb8c   :  { %7913 = vmatmul.mubr.f32.vlgmr.msra.gmra.mxu0 %v4921_v31  ;;  %7922 = vmatprep.subr.mxu0 %v8605_v44 }
 0xb8d   :  { %7923 = vmatpush3.msra.mxu0 %v8605_v44  ;;  %7926 = vmatprep.mubr.f32.mxu0 %v4910_v60  ;;  %v5541_v60 = vand.u32 4294901760, %v5540_v52 }
 0xb8e   :  { %7924 = vmatprep.subr.mxu0 %v8612_v56  ;;  %7944 = vmatpush3.msra.mxu1 %v5534_v28 }
 0xb8f   :  { %7925 = vmatpush3.msra.mxu0 %v8612_v56  ;;  %7945 = vmatprep.subr.mxu1 %v5541_v60 }
 0xb90   :  { %7927 = vmatmul.mubr.f32.vlgmr.msra.gmra.mxu0 %v4920_v20  ;;  %7936 = vmatprep.subr.mxu0 %v8634_v8 }
 0xb91   :  { %7937 = vmatpush3.msra.mxu0 %v8634_v8  ;;  %7946 = vmatpush3.msra.mxu1 %v5541_v60 }
 0xb92   :  { %7938 = vmatprep.subr.mxu0 %v8636_v10  ;;  %7957 = vmatprep.subr.mxu1 %v8634_v8 }
 0xb93   :  { %7939 = vmatpush3.msra.mxu0 %v8636_v10 }
 0xb94   :  { %7950 = vmatprep.subr.mxu0 %v8639_v23 }
 0xc40   :  { %v7907_v22 = vpop.f32.mrf.mxu1 }
 0xc42   :  { %v5007_v36 = vpop.f32.mrf.mxu1 }
 0xc44   :  { %v7921_v40 = vpop.f32.mrf.mxu1 }
 0xc46   :  { %v5171_v2 = vpop.f32.mrf.mxu1 }
 0xc48   :  { %v7900_v51 = vpop.f32.mrf.mxu0 }
 0xc49   :  { %v4927_v42 = vadd.f32 %v7900_v51, %v7096_v39  ;;  %v7935_v43 = vpop.f32.mrf.mxu1 }
 0xc4a   :  { %v4916_v46 = vpop.f32.mrf.mxu0 }
 0xc4b   :  { %v4917_v54 = vadd.f32 %v7096_v39, %v4916_v46  ;;  %v5014_v55 = vadd.f32 %v7907_v22, %v4927_v42  ;;  %v5335_v56 = vpop.f32.mrf.mxu1  ;;  %v7099_v42 = vld [vmem:[#allocation5 + $0xb1] ss:$0 sm:$0xff] }
 0xc4c   :  { %v7914_v12 = vpop.f32.mrf.mxu0 }
 0xc4d   :  { %v5097_v15 = vadd.f32 %v7914_v12, %v5014_v55  ;;  %v5008_v3 = vadd.f32 %v5007_v36, %v4917_v54 }
 0xc4e   :  { %v5089_v38 = vpop.f32.mrf.mxu0 }
 0xc4f   :  { %v5090_v14 = vadd.f32 %v5089_v38, %v5008_v3  ;;  %v5180_v41 = vadd.f32 %v7921_v40, %v5097_v15 }
 0xc50   :  { %v7928_v44 = vpop.f32.mrf.mxu0 }
 0xc51   :  { %v5263_v47 = vadd.f32 %v7928_v44, %v5180_v41  ;;  %v5172_v49 = vadd.f32 %v5171_v2, %v5090_v14  ;;  %v7100_v2 = vld [vmem:[#allocation5 + $0xb5] ss:$0 sm:$0xff] }
 0xc52   :  { %v5256_v50 = vpop.f32.mrf.mxu0 }
 0xc53   :  { %v5342_v58 = vadd.f32 %v7935_v43, %v5263_v47  ;;  %v5257_v62 = vadd.f32 %v5256_v50, %v5172_v49 }
 0xc55   :  { %v5348_v35 = vmin.f32 %v5342_v58, 0.0  ;;  %v5336_v19 = vadd.f32 %v5335_v56, %v5257_v62  ;;  %vm5346_vm3 = vcmp.gt.f32.partialorder %v5342_v58, 0.0 }
 0xc57   :  { %v5351_v57 = vmul.f32 1.442695, %v5348_v35  ;;  %v5347_v13 = vmin.f32 %v5336_v19, 0.0  ;;  %vm5345_vm4 = vcmp.gt.f32.partialorder %v5336_v19, 0.0 }
 0xc59   :  { %8078 = vpow2.f32 %v5351_v57  ;;  %v5349_v59 = vmul.f32 1.442695, %v5347_v13 }
 0xc5b   :  { %8080 = vpow2.f32 %v5349_v59 }
 0xc66   :  { %v8079_v61 = vpop.eup %8078 }
 0xc67   :  { %v7098_v63 = vadd.f32 -1.0, %v8079_v61  ;;  %v7101_v61 = vld [vmem:[#allocation5 + $0xb9] ss:$0 sm:$0xff] }
 0xc68   :  { %v8081_v48 = vpop.eup %8080 }
 0xc69   :  { %v5356_v0 = vsel %vm5346_vm3, %v5342_v58, %v7098_v63  ;;  %v7097_v1 = vadd.f32 -1.0, %v8081_v48 }
 0xc6a   :  { %v5365_v37 = vsel %vm556_vm1, %v5356_v0, 0.0  ;;  %v5371_v6 = vmul.f32 %v5356_v0, %v5356_v0 }
 0xc6b   :  { %5366 = vadd.xlane.f32.xlu0 %v5365_v37  ;;  %v5355_v9 = vsel %vm5345_vm4, %v5336_v19, %v7097_v1 }
 0xc6c   :  { %v5362_v4 = vsel %vm556_vm1, %v5355_v9, 0.0  ;;  %v5370_v45 = vmul.f32 %v5355_v9, %v5355_v9  ;;  %v5375_v24 = vsel %vm556_vm1, %v5371_v6, 0.0 }
 0xc6d   :  { %5363 = vadd.xlane.f32.xlu1 %v5362_v4 }
 0xc6e   :  { %v5372_v5 = vsel %vm556_vm1, %v5370_v45, 0.0 }
 0xc6f   :  { %5376 = vadd.xlane.f32.xlu0 %v5375_v24 }
 0xc71   :  { %5373 = vadd.xlane.f32.xlu1 %v5372_v5 }
 0xcf4   :  { %v5367_v21 = vpop.xlane.xlu0 %5366 }
 0xcf5   :  { %v5369_v27 = vmul.f32 0.0625, %v5367_v21 }
 0xcf6   :  { %v5364_v29 = vpop.xlane.xlu1 %5363 }
 0xcf7   :  { %v5368_v20 = vmul.f32 0.0625, %v5364_v29  ;;  %v5383_v31 = vmul.f32 %v5369_v27, %v5369_v27  ;;  %v5381_v40 = vsub.f32 %v5356_v0, %v5369_v27 }
 0xcf8   :  { %v5377_v30 = vpop.xlane.xlu0 %5376 }
 0xcf9   :  { %v5379_v32 = vmul.f32 0.0625, %v5377_v30  ;;  %v5382_v26 = vmul.f32 %v5368_v20, %v5368_v20  ;;  %v5380_v46 = vsub.f32 %v5355_v9, %v5368_v20 }
 0xcfa   :  { %v5374_v53 = vpop.xlane.xlu1 %5373 }
 0xcfb   :  { %v5385_v33 = vsub.f32 %v5379_v32, %v5383_v31  ;;  %v5378_v34 = vmul.f32 0.0625, %v5374_v53 }
 0xcfd   :  { %v5387_v22 = vadd.f32 1e-05, %v5385_v33  ;;  %v5384_v36 = vsub.f32 %v5378_v34, %v5382_v26 }
 0xcff   :  { %8082 = vrsqrt.f32 %v5387_v22  ;;  %v5386_v39 = vadd.f32 1e-05, %v5384_v36 }
 0xd01   :  { %8084 = vrsqrt.f32 %v5386_v39 }
 0xd0c   :  { %v8083_v51 = vpop.eup %8082 }
 0xd0d   :  { %v5391_v54 = vmul.f32 %v8083_v51, %v5381_v40  ;;  %v5929_v51 = vld [vmem:[#allocation5 + $0x98] sm:$0xff] }
 0xd0e   :  { %v8085_v55 = vpop.eup %8084 }
 0xd0f   :  { %v5390_v12 = vmul.f32 %v8085_v55, %v5380_v46  ;;  %v5397_v15 = vmul.f32 %v7099_v42, %v5391_v54  ;;  %v8680_v46 = vand.u32 4294901760, %v5929_v51 }
 0xd11   :  { %v5396_v3 = vmul.f32 %v7099_v42, %v5390_v12  ;;  %v5403_v38 = vadd.f32 %v7100_v2, %v5397_v15  ;;  %v5928_v42 = vld [vmem:[#allocation5 + $0x90] sm:$0xff]  ;;  %v8685_v55 = vsub.f32 %v5929_v51, %v8680_v46 }
 0xd12   :  { %v8682_v54 = vand.u32 4294901760, %v5928_v42 }
 0xd13   :  { %v5402_v14 = vadd.f32 %v7100_v2, %v5396_v3  ;;  %v5412_v41 = vsel %vm556_vm1, %v5403_v38, 0  ;;  %v8693_v12 = vand.u32 4294901760, %v8685_v55 }
 0xd14   :  { %v5491_v43 = vand.u32 4294901760, %v5412_v41  ;;  %v8688_v2 = vsub.f32 %v5928_v42, %v8682_v54 }
 0xd15   :  { %v5409_v44 = vsel %vm556_vm1, %v5402_v14, 0  ;;  %v6104_v3 = vsub.f32 %v8685_v55, %v8693_v12 }
 0xd16   :  { %v5481_v47 = vand.u32 4294901760, %v5409_v44  ;;  %v5492_v49 = vsub.f32 %v5412_v41, %v5491_v43  ;;  %v8696_v15 = vand.u32 4294901760, %v8688_v2 }
 0xd17   :  { %v6105_v14 = vand.u32 4294901760, %v6104_v3 }
 0xd18   :  { %7947 = vmatprep.mubr.f32.mxu1 %v5481_v47  ;;  %v5482_v50 = vsub.f32 %v5409_v44, %v5481_v47  ;;  %v5493_v58 = vand.u32 4294901760, %v5492_v49  ;;  %v6111_v38 = vsub.f32 %v8688_v2, %v8696_v15 }
 0xd19   :  { %7948 = vmatmul.mubr.f32.vlgmr.msra.gmra.mxu1 %v5491_v43 }
 0xd1a   :  { %7958 = vmatpush3.msra.mxu1 %v8634_v8  ;;  %v5483_v62 = vand.u32 4294901760, %v5482_v50  ;;  %v5494_v56 = vsub.f32 %v5492_v49, %v5493_v58  ;;  %v6112_v41 = vand.u32 4294901760, %v6111_v38 }
 0xd1b   :  { %7959 = vmatprep.subr.mxu1 %v8636_v10 }
 0xd1c   :  { %7960 = vmatpush3.msra.mxu1 %v8636_v10  ;;  %7961 = vmatprep.mubr.f32.mxu1 %v5483_v62  ;;  %v5484_v35 = vsub.f32 %v5482_v50, %v5483_v62  ;;  %v5495_v57 = vand.u32 4294901760, %v5494_v56 }
 0xd1d   :  { %7962 = vmatmul.mubr.f32.vlgmr.msra.gmra.mxu1 %v5493_v58  ;;  %7971 = vmatprep.subr.mxu1 %v8634_v8 }
 0xd1e   :  { %7972 = vmatpush3.msra.mxu1 %v8634_v8  ;;  %7975 = vmatprep.mubr.f32.mxu1 %v5481_v47  ;;  %v5485_v19 = vand.u32 4294901760, %v5484_v35 }
 0xd1f   :  { %7973 = vmatprep.subr.mxu1 %v8636_v10 }
 0xd20   :  { %7940 = vmatprep.mubr.f32.mxu0 %v5485_v19  ;;  %7974 = vmatpush3.msra.mxu1 %v8636_v10 }
 0xd21   :  { %7941 = vmatmul.mubr.f32.vlgmr.msra.gmra.mxu0 %v5495_v57  ;;  %7976 = vmatmul.mubr.f32.vlgmr.msra.gmra.mxu1 %v5491_v43 }
 0xd22   :  { %7951 = vmatpush3.msra.mxu0 %v8639_v23  ;;  %7954 = vmatprep.mubr.f32.mxu0 %v5482_v50 }
 0xd23   :  { %7952 = vmatprep.subr.mxu0 %v8642_v11  ;;  %7985 = vmatprep.subr.mxu1 %v6105_v14 }
 0xd24   :  { %7953 = vmatpush3.msra.mxu0 %v8642_v11  ;;  %7986 = vmatpush3.msra.mxu1 %v6105_v14 }
 0xd25   :  { %7955 = vmatmul.mubr.f32.vlgmr.msra.gmra.mxu0 %v5492_v49  ;;  %7964 = vmatprep.subr.mxu0 %v8647_v16 }
 0xd26   :  { %7965 = vmatpush3.msra.mxu0 %v8647_v16  ;;  %7968 = vmatprep.mubr.f32.mxu0 %v5481_v47 }
 0xd27   :  { %7966 = vmatprep.subr.mxu0 %v8650_v17  ;;  %7987 = vmatprep.subr.mxu1 %v6112_v41 }
 0xd28   :  { %7967 = vmatpush3.msra.mxu0 %v8650_v17  ;;  %7988 = vmatpush3.msra.mxu1 %v6112_v41 }
 0xd29   :  { %7969 = vmatmul.mubr.f32.vlgmr.msra.gmra.mxu0 %v5491_v43  ;;  %7978 = vmatprep.subr.mxu0 %v8680_v46 }
 0xd2a   :  { %7979 = vmatpush3.msra.mxu0 %v8680_v46  ;;  %7999 = vmatprep.subr.mxu1 %v8680_v46 }
 0xd2b   :  { %7980 = vmatprep.subr.mxu0 %v8682_v54 }
 0xd2c   :  { %7981 = vmatpush3.msra.mxu0 %v8682_v54 }
 0xd2d   :  { %7992 = vmatprep.subr.mxu0 %v8685_v55 }
 0xdd9   :  { %v7949_v13 = vpop.f32.mrf.mxu1 }
 0xddb   :  { %v5578_v59 = vpop.f32.mrf.mxu1 }
 0xddd   :  { %v7963_v63 = vpop.f32.mrf.mxu1 }
 0xddf   :  { %v5742_v9 = vpop.f32.mrf.mxu1 }
 0xde1   :  { %v7942_v48 = vpop.f32.mrf.mxu0  ;;  %v7977_v8 = vpop.f32.mrf.mxu1 }
 0xde2   :  { %v5498_v0 = vadd.f32 %v7942_v48, %v7101_v61 }
 0xde3   :  { %v5487_v1 = vpop.f32.mrf.mxu0  ;;  %v5906_v52 = vpop.f32.mrf.mxu1 }
 0xde4   :  { %v5488_v37 = vadd.f32 %v7101_v61, %v5487_v1  ;;  %v5585_v6 = vadd.f32 %v7949_v13, %v5498_v0  ;;  %v7104_v0 = vld [vmem:[#allocation5 + $0xb2] ss:$0 sm:$0xff] }
 0xde5   :  { %v7956_v4 = vpop.f32.mrf.mxu0 }
 0xde6   :  { %v5668_v45 = vadd.f32 %v7956_v4, %v5585_v6  ;;  %v5579_v24 = vadd.f32 %v5578_v59, %v5488_v37 }
 0xde7   :  { %v5660_v5 = vpop.f32.mrf.mxu0 }
 0xde8   :  { %v5661_v18 = vadd.f32 %v5660_v5, %v5579_v24  ;;  %v5751_v7 = vadd.f32 %v7963_v63, %v5668_v45 }
 0xde9   :  { %v7970_v10 = vpop.f32.mrf.mxu0 }
 0xdea   :  { %v5834_v23 = vadd.f32 %v7970_v10, %v5751_v7  ;;  %v5743_v11 = vadd.f32 %v5742_v9, %v5661_v18  ;;  %v7105_v9 = vld [vmem:[#allocation5 + $0xb6] ss:$0 sm:$0xff] }
 0xdeb   :  { %v5827_v16 = vpop.f32.mrf.mxu0 }
 0xdec   :  { %v5913_v17 = vadd.f32 %v7977_v8, %v5834_v23  ;;  %v5828_v25 = vadd.f32 %v5827_v16, %v5743_v11 }
 0xdee   :  { %v5919_v28 = vmin.f32 %v5913_v17, 0.0  ;;  %v5907_v60 = vadd.f32 %v5906_v52, %v5828_v25  ;;  %vm5917_vm5 = vcmp.gt.f32.partialorder %v5913_v17, 0.0 }
 0xdf0   :  { %v5922_v21 = vmul.f32 1.442695, %v5919_v28  ;;  %v5918_v27 = vmin.f32 %v5907_v60, 0.0  ;;  %vm5916_vm6 = vcmp.gt.f32.partialorder %v5907_v60, 0.0 }
 0xdf2   :  { %8086 = vpow2.f32 %v5922_v21  ;;  %v5920_v29 = vmul.f32 1.442695, %v5918_v27 }
 0xdf4   :  { %8088 = vpow2.f32 %v5920_v29 }
 0xdff   :  { %v8087_v20 = vpop.eup %8086 }
 0xe00   :  { %v7103_v30 = vadd.f32 -1.0, %v8087_v20  ;;  %v7106_v20 = vld [vmem:[#allocation5 + $0xba] ss:$0 sm:$0xff] }
 0xe01   :  { %v8089_v31 = vpop.eup %8088 }
 0xe02   :  { %v5927_v32 = vsel %vm5917_vm5, %v5913_v17, %v7103_v30  ;;  %v7102_v53 = vadd.f32 -1.0, %v8089_v31 }
 0xe03   :  { %v5936_v26 = vsel %vm556_vm1, %v5927_v32, 0.0  ;;  %v5942_v33 = vmul.f32 %v5927_v32, %v5927_v32 }
 0xe04   :  { %5937 = vadd.xlane.f32.xlu0 %v5936_v26  ;;  %v5926_v34 = vsel %vm5916_vm6, %v5907_v60, %v7102_v53 }
 0xe05   :  { %v5933_v22 = vsel %vm556_vm1, %v5926_v34, 0.0  ;;  %v5941_v36 = vmul.f32 %v5926_v34, %v5926_v34  ;;  %v5946_v39 = vsel %vm556_vm1, %v5942_v33, 0.0 }
 0xe06   :  { %5934 = vadd.xlane.f32.xlu1 %v5933_v22 }
 0xe07   :  { %v5943_v40 = vsel %vm556_vm1, %v5941_v36, 0.0 }
 0xe08   :  { %5947 = vadd.xlane.f32.xlu0 %v5946_v39 }
 0xe0a   :  { %5944 = vadd.xlane.f32.xlu1 %v5943_v40 }
 0xe8d   :  { %v5938_v43 = vpop.xlane.xlu0 %5937 }
 0xe8e   :  { %v5940_v44 = vmul.f32 0.0625, %v5938_v43 }
 0xe8f   :  { %v5935_v47 = vpop.xlane.xlu1 %5934 }
 0xe90   :  { %v5939_v49 = vmul.f32 0.0625, %v5935_v47  ;;  %v5954_v58 = vmul.f32 %v5940_v44, %v5940_v44  ;;  %v5952_v63 = vsub.f32 %v5927_v32, %v5940_v44 }
 0xe91   :  { %v5948_v50 = vpop.xlane.xlu0 %5947 }
 0xe92   :  { %v5950_v62 = vmul.f32 0.0625, %v5948_v50  ;;  %v5953_v35 = vmul.f32 %v5939_v49, %v5939_v49  ;;  %v5951_v1 = vsub.f32 %v5926_v34, %v5939_v49 }
 0xe93   :  { %v5945_v56 = vpop.xlane.xlu1 %5944 }
 0xe94   :  { %v5956_v19 = vsub.f32 %v5950_v62, %v5954_v58  ;;  %v5949_v57 = vmul.f32 0.0625, %v5945_v56 }
 0xe96   :  { %v5958_v13 = vadd.f32 1e-05, %v5956_v19  ;;  %v5955_v59 = vsub.f32 %v5949_v57, %v5953_v35 }
 0xe98   :  { %8090 = vrsqrt.f32 %v5958_v13  ;;  %v5957_v61 = vadd.f32 1e-05, %v5955_v59 }
 0xe9a   :  { %8092 = vrsqrt.f32 %v5957_v61 }
 0xea5   :  { %v8091_v48 = vpop.eup %8090 }
 0xea6   :  { %v5962_v37 = vmul.f32 %v8091_v48, %v5952_v63  ;;  %v6500_v48 = vld [vmem:[#allocation5 + $0xa8] sm:$0xff] }
 0xea7   :  { %v8093_v6 = vpop.eup %8092 }
 0xea8   :  { %v5961_v4 = vmul.f32 %v8093_v6, %v5951_v1  ;;  %v5968_v45 = vmul.f32 %v7104_v0, %v5962_v37  ;;  %v8726_v1 = vand.u32 4294901760, %v6500_v48 }
 0xeaa   :  { %v5967_v24 = vmul.f32 %v7104_v0, %v5961_v4  ;;  %v5974_v5 = vadd.f32 %v7105_v9, %v5968_v45  ;;  %v6499_v0 = vld [vmem:[#allocation5 + $0xa0] sm:$0xff]  ;;  %v8731_v6 = vsub.f32 %v6500_v48, %v8726_v1 }
 0xeab   :  { %v8728_v37 = vand.u32 4294901760, %v6499_v0 }
 0xeac   :  { %v5973_v18 = vadd.f32 %v7105_v9, %v5967_v24  ;;  %v5983_v7 = vsel %vm556_vm1, %v5974_v5, 0  ;;  %v8739_v4 = vand.u32 4294901760, %v8731_v6 }
 0xead   :  { %v6062_v8 = vand.u32 4294901760, %v5983_v7  ;;  %v8734_v9 = vsub.f32 %v6499_v0, %v8728_v37 }
 0xeae   :  { %v5980_v10 = vsel %vm556_vm1, %v5973_v18, 0  ;;  %v6675_v24 = vsub.f32 %v8731_v6, %v8739_v4 }
 0xeaf   :  { %v6052_v23 = vand.u32 4294901760, %v5980_v10  ;;  %v6063_v11 = vsub.f32 %v5983_v7, %v6062_v8  ;;  %v8742_v45 = vand.u32 4294901760, %v8734_v9 }
 0xeb0   :  { %v6676_v18 = vand.u32 4294901760, %v6675_v24 }
 0xeb1   :  { %7989 = vmatprep.mubr.f32.mxu1 %v6052_v23  ;;  %v6053_v16 = vsub.f32 %v5980_v10, %v6052_v23  ;;  %v6064_v17 = vand.u32 4294901760, %v6063_v11  ;;  %v6682_v5 = vsub.f32 %v8734_v9, %v8742_v45 }
 0xeb2   :  { %7990 = vmatmul.mubr.f32.vlgmr.msra.gmra.mxu1 %v6062_v8 }
 0xeb3   :  { %8000 = vmatpush3.msra.mxu1 %v8680_v46  ;;  %v6054_v25 = vand.u32 4294901760, %v6053_v16  ;;  %v6065_v52 = vsub.f32 %v6063_v11, %v6064_v17  ;;  %v6683_v7 = vand.u32 4294901760, %v6682_v5 }
 0xeb4   :  { %8001 = vmatprep.subr.mxu1 %v8682_v54 }
 0xeb5   :  { %8002 = vmatpush3.msra.mxu1 %v8682_v54  ;;  %8003 = vmatprep.mubr.f32.mxu1 %v6054_v25  ;;  %v6055_v28 = vsub.f32 %v6053_v16, %v6054_v25  ;;  %v6066_v21 = vand.u32 4294901760, %v6065_v52 }
 0xeb6   :  { %8004 = vmatmul.mubr.f32.vlgmr.msra.gmra.mxu1 %v6064_v17  ;;  %8013 = vmatprep.subr.mxu1 %v8680_v46 }
 0xeb7   :  { %8014 = vmatpush3.msra.mxu1 %v8680_v46  ;;  %8017 = vmatprep.mubr.f32.mxu1 %v6052_v23  ;;  %v6056_v60 = vand.u32 4294901760, %v6055_v28 }
 0xeb8   :  { %8015 = vmatprep.subr.mxu1 %v8682_v54 }
 0xeb9   :  { %7982 = vmatprep.mubr.f32.mxu0 %v6056_v60  ;;  %8016 = vmatpush3.msra.mxu1 %v8682_v54 }
 0xeba   :  { %7983 = vmatmul.mubr.f32.vlgmr.msra.gmra.mxu0 %v6066_v21  ;;  %8018 = vmatmul.mubr.f32.vlgmr.msra.gmra.mxu1 %v6062_v8 }
 0xebb   :  { %7993 = vmatpush3.msra.mxu0 %v8685_v55  ;;  %7996 = vmatprep.mubr.f32.mxu0 %v6053_v16 }
 0xebc   :  { %7994 = vmatprep.subr.mxu0 %v8688_v2  ;;  %8027 = vmatprep.subr.mxu1 %v6676_v18 }
 0xebd   :  { %7995 = vmatpush3.msra.mxu0 %v8688_v2  ;;  %8028 = vmatpush3.msra.mxu1 %v6676_v18 }
 0xebe   :  { %7997 = vmatmul.mubr.f32.vlgmr.msra.gmra.mxu0 %v6063_v11  ;;  %8006 = vmatprep.subr.mxu0 %v8693_v12 }
 0xebf   :  { %8007 = vmatpush3.msra.mxu0 %v8693_v12  ;;  %8010 = vmatprep.mubr.f32.mxu0 %v6052_v23 }
 0xec0   :  { %8008 = vmatprep.subr.mxu0 %v8696_v15  ;;  %8029 = vmatprep.subr.mxu1 %v6683_v7 }
 0xec1   :  { %8009 = vmatpush3.msra.mxu0 %v8696_v15  ;;  %8030 = vmatpush3.msra.mxu1 %v6683_v7 }
 0xec2   :  { %8011 = vmatmul.mubr.f32.vlgmr.msra.gmra.mxu0 %v6062_v8  ;;  %8020 = vmatprep.subr.mxu0 %v8726_v1 }
 0xec3   :  { %8021 = vmatpush3.msra.mxu0 %v8726_v1  ;;  %8041 = vmatprep.subr.mxu1 %v8726_v1 }
 0xec4   :  { %8022 = vmatprep.subr.mxu0 %v8728_v37 }
 0xec5   :  { %8023 = vmatpush3.msra.mxu0 %v8728_v37 }
 0xec6   :  { %8034 = vmatprep.subr.mxu0 %v8731_v6 }
 0xf72   :  { %v7991_v27 = vpop.f32.mrf.mxu1 }
 0xf74   :  { %v6149_v29 = vpop.f32.mrf.mxu1 }
 0xf76   :  { %v8005_v30 = vpop.f32.mrf.mxu1 }
 0xf78   :  { %v6313_v34 = vpop.f32.mrf.mxu1 }
 0xf7a   :  { %v7984_v31 = vpop.f32.mrf.mxu0  ;;  %v8019_v46 = vpop.f32.mrf.mxu1 }
 0xf7b   :  { %v6069_v32 = vadd.f32 %v7984_v31, %v7106_v20 }
 0xf7c   :  { %v6058_v53 = vpop.f32.mrf.mxu0  ;;  %v6477_v38 = vpop.f32.mrf.mxu1 }
 0xf7d   :  { %v6059_v26 = vadd.f32 %v7106_v20, %v6058_v53  ;;  %v6156_v33 = vadd.f32 %v7991_v27, %v6069_v32  ;;  %v7109_v32 = vld [vmem:[#allocation5 + $0xb3] ss:$0 sm:$0xff] }
 0xf7e   :  { %v7998_v22 = vpop.f32.mrf.mxu0 }
 0xf7f   :  { %v6239_v36 = vadd.f32 %v7998_v22, %v6156_v33  ;;  %v6150_v39 = vadd.f32 %v6149_v29, %v6059_v26 }
 0xf80   :  { %v6231_v40 = vpop.f32.mrf.mxu0 }
 0xf81   :  { %v6232_v51 = vadd.f32 %v6231_v40, %v6150_v39  ;;  %v6322_v42 = vadd.f32 %v8005_v30, %v6239_v36 }
 0xf82   :  { %v8012_v54 = vpop.f32.mrf.mxu0 }
 0xf83   :  { %v6405_v55 = vadd.f32 %v8012_v54, %v6322_v42  ;;  %v6314_v2 = vadd.f32 %v6313_v34, %v6232_v51  ;;  %v7110_v34 = vld [vmem:[#allocation5 + $0xb7] ss:$0 sm:$0xff] }
 0xf84   :  { %v6398_v12 = vpop.f32.mrf.mxu0 }
 0xf85   :  { %v6484_v15 = vadd.f32 %v8019_v46, %v6405_v55  ;;  %v6399_v3 = vadd.f32 %v6398_v12, %v6314_v2 }
 0xf87   :  { %v6490_v14 = vmin.f32 %v6484_v15, 0.0  ;;  %v6478_v41 = vadd.f32 %v6477_v38, %v6399_v3  ;;  %vm6488_vm7 = vcmp.gt.f32.partialorder %v6484_v15, 0.0 }
 0xf89   :  { %v6493_v43 = vmul.f32 1.442695, %v6490_v14  ;;  %v6489_v44 = vmin.f32 %v6478_v41, 0.0  ;;  %vm6487_vm8 = vcmp.gt.f32.partialorder %v6478_v41, 0.0 }
 0xf8b   :  { %8094 = vpow2.f32 %v6493_v43  ;;  %v6491_v47 = vmul.f32 1.442695, %v6489_v44 }
 0xf8d   :  { %8096 = vpow2.f32 %v6491_v47 }
 0xf98   :  { %v8095_v49 = vpop.eup %8094 }
 0xf99   :  { %v7108_v50 = vadd.f32 -1.0, %v8095_v49  ;;  %v7111_v49 = vld [vmem:[#allocation5 + $0xbb] ss:$0 sm:$0xff] }
 0xf9a   :  { %v8097_v58 = vpop.eup %8096 }
 0xf9b   :  { %v6498_v62 = vsel %vm6488_vm7, %v6484_v15, %v7108_v50  ;;  %v7107_v56 = vadd.f32 -1.0, %v8097_v58 }
 0xf9c   :  { %v6507_v35 = vsel %vm556_vm1, %v6498_v62, 0.0  ;;  %v6513_v19 = vmul.f32 %v6498_v62, %v6498_v62 }
 0xf9d   :  { %6508 = vadd.xlane.f32.xlu0 %v6507_v35  ;;  %v6497_v57 = vsel %vm6487_vm8, %v6478_v41, %v7107_v56 }
 0xf9e   :  { %v6504_v13 = vsel %vm556_vm1, %v6497_v57, 0.0  ;;  %v6512_v59 = vmul.f32 %v6497_v57, %v6497_v57  ;;  %v6517_v61 = vsel %vm556_vm1, %v6513_v19, 0.0 }
 0xf9f   :  { %6505 = vadd.xlane.f32.xlu1 %v6504_v13 }
 0xfa0   :  { %v6514_v63 = vsel %vm556_vm1, %v6512_v59, 0.0 }
 0xfa1   :  { %6518 = vadd.xlane.f32.xlu0 %v6517_v61 }
 0xfa3   :  { %6515 = vadd.xlane.f32.xlu1 %v6514_v63 }
0x1026   :  { %v6509_v8 = vpop.xlane.xlu0 %6508 }
0x1027   :  { %v6511_v10 = vmul.f32 0.0625, %v6509_v8 }
0x1028   :  { %v6506_v23 = vpop.xlane.xlu1 %6505 }
0x1029   :  { %v6510_v11 = vmul.f32 0.0625, %v6506_v23  ;;  %v6525_v17 = vmul.f32 %v6511_v10, %v6511_v10  ;;  %v6523_v30 = vsub.f32 %v6498_v62, %v6511_v10 }
0x102a   :  { %v6519_v16 = vpop.xlane.xlu0 %6518 }
0x102b   :  { %v6521_v25 = vmul.f32 0.0625, %v6519_v16  ;;  %v6524_v28 = vmul.f32 %v6510_v11, %v6510_v11  ;;  %v6522_v53 = vsub.f32 %v6497_v57, %v6510_v11 }
0x102c   :  { %v6516_v52 = vpop.xlane.xlu1 %6515 }
0x102d   :  { %v6527_v60 = vsub.f32 %v6521_v25, %v6525_v17  ;;  %v6520_v21 = vmul.f32 0.0625, %v6516_v52 }
0x102f   :  { %v6529_v27 = vadd.f32 1e-05, %v6527_v60  ;;  %v6526_v29 = vsub.f32 %v6520_v21, %v6524_v28 }
0x1031   :  { %8098 = vrsqrt.f32 %v6529_v27  ;;  %v6528_v20 = vadd.f32 1e-05, %v6526_v29 }
0x1033   :  { %8100 = vrsqrt.f32 %v6528_v20 }
0x103e   :  { %v8099_v31 = vpop.eup %8098 }
0x103f   :  { %v6533_v26 = vmul.f32 %v8099_v31, %v6523_v30 }
0x1040   :  { %v8101_v33 = vpop.eup %8100 }
0x1041   :  { %v6532_v22 = vmul.f32 %v8101_v33, %v6522_v53  ;;  %v6539_v36 = vmul.f32 %v7109_v32, %v6533_v26 }
0x1043   :  { %v6538_v39 = vmul.f32 %v7109_v32, %v6532_v22  ;;  %v6545_v40 = vadd.f32 %v7110_v34, %v6539_v36 }
0x1045   :  { %v6544_v51 = vadd.f32 %v7110_v34, %v6538_v39  ;;  %v6554_v42 = vsel %vm556_vm1, %v6545_v40, 0 }
0x1046   :  { %v6633_v46 = vand.u32 4294901760, %v6554_v42 }
0x1047   :  { %v6551_v54 = vsel %vm556_vm1, %v6544_v51, 0 }
0x1048   :  { %v6623_v55 = vand.u32 4294901760, %v6551_v54  ;;  %v6634_v2 = vsub.f32 %v6554_v42, %v6633_v46 }
0x104a   :  { %8031 = vmatprep.mubr.f32.mxu1 %v6623_v55  ;;  %v6624_v12 = vsub.f32 %v6551_v54, %v6623_v55  ;;  %v6635_v15 = vand.u32 4294901760, %v6634_v2 }
0x104b   :  { %8032 = vmatmul.mubr.f32.vlgmr.msra.gmra.mxu1 %v6633_v46 }
0x104c   :  { %8042 = vmatpush3.msra.mxu1 %v8726_v1  ;;  %v6625_v3 = vand.u32 4294901760, %v6624_v12  ;;  %v6636_v38 = vsub.f32 %v6634_v2, %v6635_v15 }
0x104d   :  { %8043 = vmatprep.subr.mxu1 %v8728_v37 }
0x104e   :  { %8044 = vmatpush3.msra.mxu1 %v8728_v37  ;;  %8045 = vmatprep.mubr.f32.mxu1 %v6625_v3  ;;  %v6626_v14 = vsub.f32 %v6624_v12, %v6625_v3  ;;  %v6637_v43 = vand.u32 4294901760, %v6636_v38 }
0x104f   :  { %8046 = vmatmul.mubr.f32.vlgmr.msra.gmra.mxu1 %v6635_v15  ;;  %8055 = vmatprep.subr.mxu1 %v8726_v1 }
0x1050   :  { %8056 = vmatpush3.msra.mxu1 %v8726_v1  ;;  %8059 = vmatprep.mubr.f32.mxu1 %v6623_v55  ;;  %v6627_v41 = vand.u32 4294901760, %v6626_v14 }
0x1051   :  { %8057 = vmatprep.subr.mxu1 %v8728_v37 }
0x1052   :  { %8024 = vmatprep.mubr.f32.mxu0 %v6627_v41  ;;  %8058 = vmatpush3.msra.mxu1 %v8728_v37 }
0x1053   :  { %8025 = vmatmul.mubr.f32.vlgmr.msra.gmra.mxu0 %v6637_v43  ;;  %8060 = vmatmul.mubr.f32.vlgmr.msra.gmra.mxu1 %v6633_v46 }
0x1054   :  { %8035 = vmatpush3.msra.mxu0 %v8731_v6  ;;  %8038 = vmatprep.mubr.f32.mxu0 %v6624_v12 }
0x1055   :  { %8036 = vmatprep.subr.mxu0 %v8734_v9 }
0x1056   :  { %8037 = vmatpush3.msra.mxu0 %v8734_v9 }
0x1057   :  { %8039 = vmatmul.mubr.f32.vlgmr.msra.gmra.mxu0 %v6634_v2  ;;  %8048 = vmatprep.subr.mxu0 %v8739_v4 }
0x1058   :  { %8049 = vmatpush3.msra.mxu0 %v8739_v4  ;;  %8052 = vmatprep.mubr.f32.mxu0 %v6623_v55 }
0x1059   :  { %8050 = vmatprep.subr.mxu0 %v8742_v45 }
0x105a   :  { %8051 = vmatpush3.msra.mxu0 %v8742_v45 }
0x105b   :  { %8053 = vmatmul.mubr.f32.vlgmr.msra.gmra.mxu0 %v6633_v46 }
0x110b   :  { %v8033_v44 = vpop.f32.mrf.mxu1 }
0x110d   :  { %v6720_v47 = vpop.f32.mrf.mxu1 }
0x110f   :  { %v8047_v50 = vpop.f32.mrf.mxu1 }
0x1111   :  { %v6884_v57 = vpop.f32.mrf.mxu1 }
0x1113   :  { %v8026_v58 = vpop.f32.mrf.mxu0  ;;  %v8061_v1 = vpop.f32.mrf.mxu1 }
0x1114   :  { %v6640_v62 = vadd.f32 %v8026_v58, %v7111_v49 }
0x1115   :  { %v6629_v56 = vpop.f32.mrf.mxu0  ;;  %v7048_v5 = vpop.f32.mrf.mxu1 }
0x1116   :  { %v6630_v35 = vadd.f32 %v7111_v49, %v6629_v56  ;;  %v6727_v19 = vadd.f32 %v8033_v44, %v6640_v62 }
0x1117   :  { %v8040_v13 = vpop.f32.mrf.mxu0 }
0x1118   :  { %v6810_v59 = vadd.f32 %v8040_v13, %v6727_v19  ;;  %v6721_v61 = vadd.f32 %v6720_v47, %v6630_v35 }
0x1119   :  { %v6802_v63 = vpop.f32.mrf.mxu0 }
0x111a   :  { %v6803_v48 = vadd.f32 %v6802_v63, %v6721_v61  ;;  %v6893_v0 = vadd.f32 %v8047_v50, %v6810_v59 }
0x111b   :  { %v8054_v37 = vpop.f32.mrf.mxu0 }
0x111c   :  { %v6976_v6 = vadd.f32 %v8054_v37, %v6893_v0  ;;  %v6885_v9 = vadd.f32 %v6884_v57, %v6803_v48 }
0x111d   :  { %v6969_v4 = vpop.f32.mrf.mxu0 }
0x111e   :  { %v7055_v45 = vadd.f32 %v8061_v1, %v6976_v6  ;;  %v6970_v24 = vadd.f32 %v6969_v4, %v6885_v9 }
0x1120   :  { %v7061_v18 = vmin.f32 %v7055_v45, 0.0  ;;  %v7049_v7 = vadd.f32 %v7048_v5, %v6970_v24  ;;  %vm7059_vm9 = vcmp.gt.f32.partialorder %v7055_v45, 0.0 }
0x1122   :  { %v7064_v8 = vmul.f32 1.442695, %v7061_v18  ;;  %v7060_v10 = vmin.f32 %v7049_v7, 0.0  ;;  %vm7058_vm10 = vcmp.gt.f32.partialorder %v7049_v7, 0.0 }
0x1124   :  { %8102 = vpow2.f32 %v7064_v8  ;;  %v7062_v23 = vmul.f32 1.442695, %v7060_v10 }
0x1126   :  { %8104 = vpow2.f32 %v7062_v23 }
0x1131   :  { %v8103_v11 = vpop.eup %8102 }
0x1132   :  { %v7113_v16 = vadd.f32 -1.0, %v8103_v11 }
0x1133   :  { %v8105_v17 = vpop.eup %8104 }
0x1134   :  { %v7112_v25 = vadd.f32 -1.0, %v8105_v17  ;;  %v7069_v52 = vsel %vm7059_vm9, %v7055_v45, %v7113_v16 }
0x1135   :  { %7071 = vst.msk [vmem:[#allocation7 + $0x8] sm:$0xff] %vm556_vm1, %v7069_v52 }
0x1136   :  { %v7068_v28 = vsel %vm7058_vm10, %v7049_v7, %v7112_v25 }
0x1137   :  { %7070 = vst.msk [vmem:[#allocation7] sm:$0xff] %vm556_vm1, %v7068_v28 }
0x1138   :  { %8157 = shalt.err (!%p8154_p0)
}
0x1139   :  { %7083 = dma.vmem_to_hbm [thread:$0]  %s7078_s9, 256, %s8780_s4, [#allocation4], %s8173_s18, %s8173_s18, %s8174_s19  }
0x113a   :  { %8170 = dma.done.wait [#allocation4], 256  }
0x113b   :  { %8171 = vsyncadd [#allocation4], 4294967040 }
0x113c   :  { %7087 = vsyncpa [#allocation3], 1 }
0x113d   :  { %7088 = vsyncpa [#allocation6], 1 }
0x113e   :  { %7089 = vsyncpa [#allocation4], 1 }

</bundles_post_ra>
